<compile_context>
chip_gen: v6e
topology: v6e:2x2x1
jax: 0.10.0
libtpu: 0.0.40
codegen_flags: <defaults>
</compile_context>

<pallas_src>
import functools

import jax
import jax.numpy as jnp
from jax.experimental import pallas as pl
from jax.experimental.pallas import tpu as pltpu

GROWTH = 32
BN_SIZE = 4
BLOCK_CONFIG = (6, 12, 48, 32)
NUM_INIT_FEATURES = 64
BN_EPS = 1e-5


def _round_up(x, m):
    return ((x + m - 1) // m) * m


def _pick_tm(m):
    for t in (512, 256):
        if m % t == 0:
            return t
    return m


def _pick_tn(n):
    if n % 256 == 0:
        return 256
    if n % 128 == 0:
        return 128
    return n


# ---------------------------------------------------------------------------
# Pallas kernels
# ---------------------------------------------------------------------------
def _matmul_kernel(a_ref, b_ref, o_ref, acc_ref):
    """K-tiled bf16 matmul, f32 accumulator, store only on the last K step."""
    @pl.when(pl.program_id(2) == 0)
    def _():
        acc_ref[...] = jnp.zeros_like(acc_ref)

    acc_ref[...] += jnp.dot(a_ref[...], b_ref[...],
                            preferred_element_type=jnp.float32)

    @pl.when(pl.program_id(2) == pl.num_programs(2) - 1)
    def _():
        o_ref[...] = acc_ref[...].astype(o_ref.dtype)


def _bn_relu_matmul_kernel(scale_ref, bias_ref, a_ref, b_ref, o_ref):
    """Fused BatchNorm affine + ReLU on the A tile, then a bf16 MXU matmul."""
    a = a_ref[...].astype(jnp.float32) * scale_ref[...] + bias_ref[...]
    a = jnp.maximum(a, 0.0).astype(jnp.bfloat16)
    o_ref[...] = jnp.dot(a, b_ref[...],
                         preferred_element_type=jnp.float32).astype(o_ref.dtype)


def _affine_kernel(x_ref, scale_ref, bias_ref, o_ref, *, relu):
    y = x_ref[...].astype(jnp.float32) * scale_ref[...] + bias_ref[...]
    if relu:
        y = jnp.maximum(y, 0.0)
    o_ref[...] = y.astype(o_ref.dtype)


def _bn_stats_kernel(x_ref, sum_ref, sq_ref):
    """Per-channel sum / sum-of-squares via MXU dots against a ones row."""
    @pl.when(pl.program_id(0) == 0)
    def _():
        sum_ref[...] = jnp.zeros_like(sum_ref)
        sq_ref[...] = jnp.zeros_like(sq_ref)

    x = x_ref[...].astype(jnp.float32)
    ones = jnp.ones((1, x.shape[0]), jnp.float32)
    sum_ref[...] += jnp.dot(ones, x, preferred_element_type=jnp.float32)
    sq_ref[...] += jnp.dot(ones, x * x, preferred_element_type=jnp.float32)


def _conv3_kernel(x_ref, w_ref, o_ref, acc_ref, *, wp, margin, cin):
    """3x3 stride-1 pad-1 conv as 9 accumulated shifted-window dots.

    x_ref is the flattened spatially padded input (rows = N*(H+2)*(W+2) plus a
    zero margin at both ends), so tap (dy, dx) is a static row shift of
    (dy-1)*wp + (dx-1). Border output rows are garbage and sliced off by the
    caller. This replaces the 9x im2col HBM blow-up entirely.
    """
    mo = o_ref.shape[0]
    acc_ref[...] = jnp.zeros_like(acc_ref)
    for dy in range(3):
        for dx in range(3):
            tap = dy * 3 + dx
            s = (dy - 1) * wp + (dx - 1)
            a = x_ref[margin + s: margin + s + mo, :]
            w = w_ref[tap * cin:(tap + 1) * cin, :].astype(jnp.float32)
            acc_ref[...] += jnp.dot(a, w, preferred_element_type=jnp.float32)
    o_ref[...] = acc_ref[...].astype(o_ref.dtype)


# ---------------------------------------------------------------------------
# Pallas-call wrappers
# ---------------------------------------------------------------------------
def _matmul_pallas(a, b, out_dtype):
    """Exact-shape (M, K) @ (K, N); K only tiled for very large K (the fc)."""
    M, K = a.shape
    _, N = b.shape
    tm = _pick_tm(M)
    tn = _pick_tn(N)
    tk = 512 if (K > 4096 and K % 512 == 0) else K
    grid = (M // tm, N // tn, K // tk)
    return pl.pallas_call(
        _matmul_kernel,
        out_shape=jax.ShapeDtypeStruct((M, N), out_dtype),
        grid_spec=pltpu.PrefetchScalarGridSpec(
            num_scalar_prefetch=0, grid=grid,
            in_specs=[pl.BlockSpec((tm, tk), lambda i, j, k: (i, k)),
                      pl.BlockSpec((tk, tn), lambda i, j, k: (k, j))],
            out_specs=pl.BlockSpec((tm, tn), lambda i, j, k: (i, j)),
            scratch_shapes=[pltpu.VMEM((tm, tn), jnp.float32)]),
        compiler_params=pltpu.CompilerParams(
            dimension_semantics=("parallel", "parallel", "arbitrary")),
    )(a, b)


@jax.jit
def _chunk_stats(x_nhwc):
    """Per-channel (sum, sum_sq) over N*H*W for a NHWC tensor."""
    N, H, W, C = x_nhwc.shape
    M = N * H * W
    x2d = x_nhwc.reshape(M, C)
    tm = _pick_tm(M)
    grid = (M // tm,)
    sums, sqs = pl.pallas_call(
        _bn_stats_kernel,
        out_shape=(jax.ShapeDtypeStruct((1, C), jnp.float32),
                   jax.ShapeDtypeStruct((1, C), jnp.float32)),
        grid_spec=pltpu.PrefetchScalarGridSpec(
            num_scalar_prefetch=0, grid=grid,
            in_specs=[pl.BlockSpec((tm, C), lambda i: (i, 0))],
            out_specs=(pl.BlockSpec((1, C), lambda i: (0, 0)),
                       pl.BlockSpec((1, C), lambda i: (0, 0)))),
        compiler_params=pltpu.CompilerParams(
            dimension_semantics=("arbitrary",)),
    )(x2d)
    return sums, sqs


def _scale_bias(sums, sqs, gamma, beta, m, c):
    # Training-mode BatchNorm (module default): biased batch variance.
    # Note: E[x^2]-E[x]^2 in f32; clamped at 0 to guard cancellation.
    mean = sums / float(m)
    var = jnp.maximum(sqs / float(m) - mean * mean, 0.0)
    scale = gamma.reshape(1, c) * jax.lax.rsqrt(var + BN_EPS)
    bias = beta.reshape(1, c) - mean * scale
    return scale, bias


@functools.partial(jax.jit, static_argnames=("relu",))
def _bn_affine(x_nhwc, sums, sqs, gamma, beta, relu):
    """Standalone BatchNorm affine (+ optional ReLU); bf16 output."""
    N, H, W, C = x_nhwc.shape
    M = N * H * W
    x2d = x_nhwc.reshape(M, C)
    scale, bias = _scale_bias(sums, sqs, gamma, beta, M, C)
    tm = _pick_tm(M)
    grid = (M // tm,)
    out = pl.pallas_call(
        functools.partial(_affine_kernel, relu=relu),
        out_shape=jax.ShapeDtypeStruct((M, C), jnp.bfloat16),
        grid_spec=pltpu.PrefetchScalarGridSpec(
            num_scalar_prefetch=0, grid=grid,
            in_specs=[pl.BlockSpec((tm, C), lambda i: (i, 0)),
                      pl.BlockSpec((1, C), lambda i: (0, 0)),
                      pl.BlockSpec((1, C), lambda i: (0, 0))],
            out_specs=pl.BlockSpec((tm, C), lambda i: (i, 0))),
        compiler_params=pltpu.CompilerParams(
            dimension_semantics=("parallel",)),
    )(x2d, scale, bias)
    return out.reshape(N, H, W, C)


@jax.jit
def _bn_relu_conv1x1(x_nhwc, sums, sqs, gamma, beta, w):
    """BN(+ReLU) fused into a 1x1 conv (rows = pixels, cols = channels)."""
    N, H, W, C = x_nhwc.shape
    M = N * H * W
    cout = w.shape[1]
    x2d = x_nhwc.reshape(M, C)
    scale, bias = _scale_bias(sums, sqs, gamma, beta, M, C)
    tm = _pick_tm(M)
    tn = _pick_tn(cout)
    grid = (M // tm, cout // tn)
    out = pl.pallas_call(
        _bn_relu_matmul_kernel,
        out_shape=jax.ShapeDtypeStruct((M, cout), jnp.bfloat16),
        grid_spec=pltpu.PrefetchScalarGridSpec(
            num_scalar_prefetch=0, grid=grid,
            in_specs=[pl.BlockSpec((1, C), lambda i, j: (0, 0)),
                      pl.BlockSpec((1, C), lambda i, j: (0, 0)),
                      pl.BlockSpec((tm, C), lambda i, j: (i, 0)),
                      pl.BlockSpec((C, tn), lambda i, j: (0, j))],
            out_specs=pl.BlockSpec((tm, tn), lambda i, j: (i, j))),
        compiler_params=pltpu.CompilerParams(
            dimension_semantics=("parallel", "parallel")),
    )(scale, bias, x2d, w)
    return out.reshape(N, H, W, cout)


@jax.jit
def _conv3x3(x_nhwc, w2d):
    """3x3 stride-1 pad-1 conv via the flat shifted-window Pallas kernel."""
    N, H, W, C = x_nhwc.shape
    cout = w2d.shape[1]
    hp, wp = H + 2, W + 2
    ng = N * hp * wp
    mo = _round_up(ng, 8)
    margin = _round_up(wp + 1, 8)
    # Spatial zero padding AFTER the (already applied) BN+ReLU, as in PyTorch;
    # then flatten and add zero-row margins so all shifted reads stay in range.
    xp = jnp.pad(x_nhwc.astype(jnp.float32),
                 ((0, 0), (1, 1), (1, 1), (0, 0))).reshape(ng, C)
    xm = jnp.pad(xp, ((margin, margin + mo - ng), (0, 0)))
    rows = xm.shape[0]
    out = pl.pallas_call(
        functools.partial(_conv3_kernel, wp=wp, margin=margin, cin=C),
        out_shape=jax.ShapeDtypeStruct((mo, cout), jnp.bfloat16),
        grid_spec=pltpu.PrefetchScalarGridSpec(
            num_scalar_prefetch=0, grid=(1,),
            in_specs=[pl.BlockSpec((rows, C), lambda i: (0, 0)),
                      pl.BlockSpec((9 * C, cout), lambda i: (0, 0))],
            out_specs=pl.BlockSpec((mo, cout), lambda i: (0, 0)),
            scratch_shapes=[pltpu.VMEM((mo, cout), jnp.float32)]),
        compiler_params=pltpu.CompilerParams(
            dimension_semantics=("arbitrary",)),
    )(xm, w2d)
    out = out[:ng].reshape(N, hp, wp, cout)[:, 1:H + 1, 1:W + 1, :]
    return out


def _im2col(x, kh, kw, stride, pad):
    # Pure data-movement glue for the 7x7/s2 stem conv ((dy, dx, c) ordering).
    N, H, W, C = x.shape
    Ho = (H + 2 * pad - kh) // stride + 1
    Wo = (W + 2 * pad - kw) // stride + 1
    xp = jnp.pad(x, ((0, 0), (pad, pad), (pad, pad), (0, 0)))
    cols = []
    for dy in range(kh):
        for dx in range(kw):
            cols.append(xp[:, dy:dy + stride * Ho:stride,
                           dx:dx + stride * Wo:stride, :])
    patches = jnp.concatenate(cols, axis=-1)
    return patches.reshape(N * Ho * Wo, kh * kw * C)


@jax.jit
def _stem_conv(x_nhwc, w):
    N, H, W, _ = x_nhwc.shape
    Ho = (H + 6 - 7) // 2 + 1
    Wo = (W + 6 - 7) // 2 + 1
    patches = _im2col(x_nhwc, 7, 7, 2, 3)
    out = _matmul_pallas(patches, w, jnp.bfloat16)
    return out.reshape(N, Ho, Wo, w.shape[1])


@jax.jit
def _classifier(x_nhwc, w, bias):
    N, H, W, C = x_nhwc.shape
    # x.view(B, -1) in PyTorch flattens in NCHW (C, H, W) order.
    flat = jnp.transpose(x_nhwc, (0, 3, 1, 2)).reshape(N, C * H * W)
    return _matmul_pallas(flat, w, jnp.float32) + bias


def maxpool_3x3_s2_p1(x):
    # TODO(synk): pooling kept as plain-JAX reduce_window (data movement).
    return jax.lax.reduce_window(
        x, jnp.asarray(-jnp.inf, x.dtype), jax.lax.max,
        window_dimensions=(1, 3, 3, 1),
        window_strides=(1, 2, 2, 1),
        padding=((0, 0), (1, 1), (1, 1), (0, 0)))


@jax.jit
def avgpool_2x2(x):
    N, H, W, C = x.shape
    xf = x.astype(jnp.float32).reshape(N, H // 2, 2, W // 2, 2, C)
    return xf.mean(axis=(2, 4)).astype(jnp.bfloat16)


# ---------------------------------------------------------------------------
# Parameters (deterministic, kaiming_normal_ like the PyTorch module)
# ---------------------------------------------------------------------------
def _kaiming_conv(key, kh, kw, cin, cout):
    std = (2.0 / (kh * kw * cin)) ** 0.5          # fan_in, gain=sqrt(2)
    w = std * jax.random.normal(key, (kh * kw * cin, cout), jnp.float32)
    return w.astype(jnp.bfloat16)                 # pre-cast once, never padded


def _bn_params(c):
    return (jnp.ones((c,), jnp.float32), jnp.zeros((c,), jnp.float32))


def build_densenet201_params(key, n_inputs=12, num_cls=17):
    counter = [0]

    def nk():
        counter[0] += 1
        return jax.random.fold_in(key, counter[0])

    params = {}
    params["conv0"] = _kaiming_conv(nk(), 7, 7, n_inputs, NUM_INIT_FEATURES)
    params["norm0"] = _bn_params(NUM_INIT_FEATURES)

    num_features = NUM_INIT_FEATURES
    for b, n_layers in enumerate(BLOCK_CONFIG):
        block = []
        for l in range(n_layers):
            cin = num_features + l * GROWTH
            block.append({
                "norm1": _bn_params(cin),
                "conv1": _kaiming_conv(nk(), 1, 1, cin, BN_SIZE * GROWTH),
                "norm2": _bn_params(BN_SIZE * GROWTH),
                "conv2": _kaiming_conv(nk(), 3, 3, BN_SIZE * GROWTH, GROWTH),
            })
        params[f"denseblock{b + 1}"] = block
        num_features += n_layers * GROWTH
        if b != len(BLOCK_CONFIG) - 1:
            params[f"transition{b + 1}"] = {
                "norm": _bn_params(num_features),
                "conv": _kaiming_conv(nk(), 1, 1, num_features,
                                      num_features // 2),
            }
            num_features //= 2
    params["norm5"] = _bn_params(num_features)     # 1920 channels

    fc_in = 122880                                 # 1920 * 8 * 8 (256x256 in)
    fc_std = (2.0 / fc_in) ** 0.5                  # kaiming_normal_ on weight
    params["fc_w"] = (fc_std * jax.random.normal(
        nk(), (fc_in, num_cls), jnp.float32)).astype(jnp.bfloat16)
    bound = 1.0 / (fc_in ** 0.5)                   # default nn.Linear bias
    params["fc_b"] = jax.random.uniform(nk(), (num_cls,), jnp.float32,
                                        -bound, bound)
    return params


# ---------------------------------------------------------------------------
# Forward pass (matches DenseNet201.forward of the PyTorch module)
# ---------------------------------------------------------------------------
def densenet201_forward(params, x_nchw):
    x = jnp.transpose(x_nchw.astype(jnp.float32),
                      (0, 2, 3, 1)).astype(jnp.bfloat16)     # NCHW -> NHWC

    # Stem: conv0 -> norm0 -> relu0 -> pool0
    x = _stem_conv(x, params["conv0"])
    g0, b0 = params["norm0"]
    s0, q0 = _chunk_stats(x)
    x = _bn_affine(x, s0, q0, g0, b0, relu=True)
    x = maxpool_3x3_s2_p1(x)

    # Dense blocks. BN batch statistics of the concatenated features are
    # maintained incrementally per chunk (channel values never change once
    # produced), so the full feature map is only read by the 1x1 convs.
    feats = x
    csum, csq = _chunk_stats(feats)

    for b in range(len(BLOCK_CONFIG)):
        for layer in params[f"denseblock{b + 1}"]:
            g1, be1 = layer["norm1"]
            y1 = _bn_relu_conv1x1(feats, csum, csq, g1, be1, layer["conv1"])
            g2, be2 = layer["norm2"]
            s2, q2 = _chunk_stats(y1)
            y1a = _bn_affine(y1, s2, q2, g2, be2, relu=True)
            y2 = _conv3x3(y1a, layer["conv2"])
            ys, yq = _chunk_stats(y2)
            csum = jnp.concatenate([csum, ys], axis=1)
            csq = jnp.concatenate([csq, yq], axis=1)
            feats = jnp.concatenate([feats, y2], axis=-1)   # dense connectivity
        if b != len(BLOCK_CONFIG) - 1:
            t = params[f"transition{b + 1}"]
            gt, bt = t["norm"]
            y = _bn_relu_conv1x1(feats, csum, csq, gt, bt, t["conv"])
            feats = avgpool_2x2(y)
            csum, csq = _chunk_stats(feats)

    g5, b5 = params["norm5"]
    x5 = _bn_affine(feats, csum, csq, g5, b5, relu=False)    # features end here
    logits = _classifier(x5, params["fc_w"], params["fc_b"])
    return logits


if __name__ == "__main__":
    key = jax.random.PRNGKey(0)
    pkey, xkey = jax.random.split(key)
    params = build_densenet201_params(pkey, n_inputs=12, num_cls=17)

    # Input spatial size 256x256 is implied by the classifier's in_features
    # (122880 = 1920 * 8 * 8); batch kept small (1).
    x = jax.random.normal(xkey, (1, 12, 256, 256), jnp.float32)

    logits = densenet201_forward(params, x)
    logits = jax.block_until_ready(logits)
    assert logits.shape == (1, 17)
    assert bool(jnp.all(jnp.isfinite(logits)))
    print("KERNEL_OK")
</pallas_src>

<mosaic_0001>
module attributes {stable_mosaic.version = 11 : i64} {
  func.func @_matmul_kernel(%arg0: i32, %arg1: i32, %arg2: i32, %arg3: memref<512x588xbf16, #tpu.memory_space<vmem>>, %arg4: memref<588x64xbf16, #tpu.memory_space<vmem>>, %arg5: memref<512x64xbf16, #tpu.memory_space<vmem>>, %arg6: memref<512x64xf32, #tpu.memory_space<vmem>>) attributes {dimension_semantics = [#tpu.dimension_semantics<parallel>, #tpu.dimension_semantics<parallel>, #tpu.dimension_semantics<arbitrary>], iteration_bounds = array<i64: 32, 1, 1>, scalar_prefetch = 0 : i64, scratch_operands = 1 : i64, tpu.core_type = #tpu.core_type<tc>, window_params = [{transform_indices = @transform_0, window_bounds = array<i64: 512, 588>}, {transform_indices = @transform_1, window_bounds = array<i64: 588, 64>}, {transform_indices = @transform_2, window_bounds = array<i64: 512, 64>}]} {
    %c0_i32 = arith.constant 0 : i32
    %0 = arith.cmpi eq, %arg2, %c0_i32 : i32
    %1 = arith.extui %0 : i1 to i32
    %c0_i32_0 = arith.constant 0 : i32
    %2 = arith.cmpi ne, %1, %c0_i32_0 : i32
    scf.if %2 {
      %cst_10 = arith.constant 0.000000e+00 : f32
      %12 = vector.broadcast %cst_10 : f32 to vector<512x64xf32>
      %c0_11 = arith.constant 0 : index
      %c0_12 = arith.constant 0 : index
      %13 = vector.load %arg6[%c0_11, %c0_12] : memref<512x64xf32, #tpu.memory_space<vmem>>, vector<512x64xf32>
      tpu.vector_store %arg6[%c0_11, %c0_12], %12 {strides = array<i32>} : memref<512x64xf32, #tpu.memory_space<vmem>>, vector<512x64xf32>,
    } else {
    }
    %c0 = arith.constant 0 : index
    %c0_1 = arith.constant 0 : index
    %3 = vector.load %arg6[%c0, %c0_1] : memref<512x64xf32, #tpu.memory_space<vmem>>, vector<512x64xf32>
    %c0_2 = arith.constant 0 : index
    %c0_3 = arith.constant 0 : index
    %4 = vector.load %arg3[%c0_2, %c0_3] : memref<512x588xbf16, #tpu.memory_space<vmem>>, vector<512x588xbf16>
    %c0_4 = arith.constant 0 : index
    %c0_5 = arith.constant 0 : index
    %5 = vector.load %arg4[%c0_4, %c0_5] : memref<588x64xbf16, #tpu.memory_space<vmem>>, vector<588x64xbf16>
    %cst = arith.constant dense<0.000000e+00> : vector<512x64xf32>
    %6 = tpu.matmul %4, %5, %cst {dimension_numbers = #tpu.dot_dimension_numbers<[1], [0], [0], [1], [0, 0, 1, 1], [], []>} : vector<512x588xbf16>, vector<588x64xbf16>, vector<512x64xf32> -> vector<512x64xf32>
    %7 = arith.addf %3, %6 : vector<512x64xf32>
    %c0_6 = arith.constant 0 : index
    %c0_7 = arith.constant 0 : index
    %8 = vector.load %arg6[%c0_6, %c0_7] : memref<512x64xf32, #tpu.memory_space<vmem>>, vector<512x64xf32>
    tpu.vector_store %arg6[%c0_6, %c0_7], %7 {strides = array<i32>} : memref<512x64xf32, #tpu.memory_space<vmem>>, vector<512x64xf32>,
    %c0_i32_8 = arith.constant 0 : i32
    %9 = arith.cmpi eq, %arg2, %c0_i32_8 : i32
    %10 = arith.extui %9 : i1 to i32
    %c0_i32_9 = arith.constant 0 : i32
    %11 = arith.cmpi ne, %10, %c0_i32_9 : i32
    scf.if %11 {
      %c0_10 = arith.constant 0 : index
      %c0_11 = arith.constant 0 : index
      %12 = vector.load %arg6[%c0_10, %c0_11] : memref<512x64xf32, #tpu.memory_space<vmem>>, vector<512x64xf32>
      %13 = arith.truncf %12 : vector<512x64xf32> to vector<512x64xbf16>
      %c0_12 = arith.constant 0 : index
      %c0_13 = arith.constant 0 : index
      %14 = vector.load %arg5[%c0_12, %c0_13] : memref<512x64xbf16, #tpu.memory_space<vmem>>, vector<512x64xbf16>
      tpu.vector_store %arg5[%c0_12, %c0_13], %13 {strides = array<i32>} : memref<512x64xbf16, #tpu.memory_space<vmem>>, vector<512x64xbf16>,
    } else {
    }
    return
  }
  func.func @transform_0(%arg0: i32, %arg1: i32, %arg2: i32) -> (i32, i32) {
    %c0_i32 = arith.constant 0 : i32
    return %arg0, %arg2 : i32, i32
  }
  func.func @transform_1(%arg0: i32, %arg1: i32, %arg2: i32) -> (i32, i32) {
    %c0_i32 = arith.constant 0 : i32
    return %arg2, %arg1 : i32, i32
  }
  func.func @transform_2(%arg0: i32, %arg1: i32, %arg2: i32) -> (i32, i32) {
    %c0_i32 = arith.constant 0 : i32
    return %arg0, %arg1 : i32, i32
  }
}

</mosaic_0001>

<bundles_post_ra>
// kernel: _stem_conv.1
= control target key start
LH: loop header
LB: loop body
LE: loop exit
PB: predicated region body
PF: predicated region fallthrough
CT: control target
= control target key end

     0   :  { %s4076_s9 = smov 0   ;;  %s4078_s10 = smov 0   ;;  %s5154_s0 = inlined_call_operand.vmem [shape: bf16[16384,588], index: 0, kind: input, shape index: {}]   ;;  %s5155_s1 = inlined_call_operand.vmem [shape: bf16[588,64], index: 1, kind: input, shape index: {}]   ;;  %s5156_s2 = inlined_call_operand.vmem [shape: bf16[16384,64], index: 2, kind: output, shape index: {}]  }
   0x1   :  { %s4080_s11 = smov 0  }
   0x2 LB: > { %s31_s12 = sadd.s32 1, %s4053_s10  ;;  %p3239_p0 = scmp.ge.s32.totalorder %s4057_s11, 1  ;;  %s4057_s11 = sphi %s4080_s11, %s12_s11   ;;  %s4053_s10 = sphi %s4078_s10, %s5192_s10   ;;  %s4049_s9 = sphi %s4076_s9, %s5191_s9  }
   0x3   : > { %p33_p1 = scmp.ge.s32.totalorder %s31_s12, 32  ;;  %p158_p2 = scmp.lt.s32.totalorder %s4057_s11, 33 }
   0x5   : > { %s5194_s12 = smov (%p33_p1, %s31_s12), 0  ;;  %p159_p3 = pnand %p3239_p0, %p158_p2 }
   0x7   : > { %162 = sbr.rel (%p159_p3) target bundleno = 603 (0x25b), region = 28 }
   0xc   : > { %v3774_v0 = vld [vmem:[%s5155_s1 + $0x38] sm:$0xff]   ;;  %v4059_v1 = vmov 0   ;;  %s3240_s15 = sshll.u32 %s4049_s9, 6  ;;  %v3775_v2 = vld [vmem:[%s5155_s1 + $0x30] sm:$0xff]   ;;  %v3776_v3 = vld [vmem:[%s5155_s1 + $0x28] sm:$0xff]   ;;  %vm1744_vm0 = vcmask 1045504  }
   0xd   : > { %1748 = vmatprep.subr.bf16.mxu0 %v4059_v1  ;;  %3714 = vmatprep.subr.bf16.mxu1 %v4059_v1  ;;  %p198_p4 = scmp.lt.s32.totalorder %s3240_s15, 2047  ;;  %v3777_v4 = vld [vmem:[%s5155_s1 + $0x20] sm:$0xff]   ;;  %v3778_v5 = vld [vmem:[%s5155_s1 + $0x18] sm:$0xff]   ;;  %v3779_v7 = vld [vmem:[%s5155_s1 + $0x10] sm:$0xff]   ;;  %vm1647_vm1 = vcmask 621568   ;;  %vm231_vm2 = vcmask 523264  }
   0xe   : > { %1749 = vmatpush1.bf16.msra.mxu0 %v3774_v0  ;;  %3730 = vmatpush1.bf16.msra.mxu1 %v3774_v0  ;;  %v3780_v9 = vld [vmem:[%s5155_s1 + $0x8] sm:$0xff]   ;;  %v3781_v10 = vld [vmem:[%s5155_s1] sm:$0xff]   ;;  %v3782_v11 = vld [vmem:[%s5155_s1 + $0x78] sm:$0xff]   ;;  %vm3067_vm3 = vcmask 519168  }
   0xf   : > { %1750 = vmatprep.subr.bf16.mxu0 %v4059_v1  ;;  %3715 = vmatprep.subr.bf16.mxu1 %v4059_v1  ;;  %s5196_s15 = smov (!%p198_p4, %s3240_s15), 2047  ;;  %v3783_v12 = vld [vmem:[%s5155_s1 + $0x70] sm:$0xff]   ;;  %v3784_v13 = vld [vmem:[%s5155_s1 + $0x68] sm:$0xff]   ;;  %v3785_v14 = vld [vmem:[%s5155_s1 + $0x60] sm:$0xff]  }
  0x10   : > { %s3747_s22 = smul.u32 20, %s5196_s15  ;;  %v3786_v15 = vld [vmem:[%s5155_s1 + $0x58] sm:$0xff]   ;;  %v3787_v16 = vld [vmem:[%s5155_s1 + $0x50] sm:$0xff]   ;;  %v3788_v17 = vld [vmem:[%s5155_s1 + $0x48] sm:$0xff]  }
  0x11   : > { %v3789_v18 = vld [vmem:[%s5155_s1 + $0x40] sm:$0xff]   ;;  %v3797_v22 = vld [vmem:[%s5155_s1 + $0xb8] sm:$0xff]   ;;  %v3798_v27 = vld [vmem:[%s5155_s1 + $0xb0] sm:$0xff]  }
  0x12   : > { %1751 = vmatpush1.bf16.msra.mxu0 %v3775_v2  ;;  %3731 = vmatpush1.bf16.msra.mxu1 %v3775_v2  ;;  %s4123_s27 = scalar_lea.vmem %s5154_s0, %s3747_s22  ;;  %v3796_v19 = vld [vmem:[%s5155_s1 + $0x120] sm:$0x3f]   ;;  %v3835_v26 = vld [vmem:[%s5155_s1 + $0x118] sm:$0xff]   ;;  %v3868_v28 = vld [vmem:[%s5155_s1 + $0x110] sm:$0xff]  }
  0x13   : > { %1752 = vmatprep.subr.bf16.mxu0 %v4059_v1  ;;  %3716 = vmatprep.subr.bf16.mxu1 %v4059_v1  ;;  %v3792_v6 = vld [vmem:[%s4123_s27 + $0x4] ss:$20 sps:$4 sm:$0xff]   ;;  %v3790_v20 = vld [vmem:[%s4123_s27] ss:$20 sps:$4 sm:$0xff]   ;;  %v1746_v23 = vsel %vm1744_vm0, %v3796_v19, 0  ;;  %v3805_v31 = vld [vmem:[%s5155_s1 + $0xa8] sm:$0xff]  }
  0x14   : > { %v3795_v8 = vld [vmem:[%s4123_s27 + $0x3c4] ss:$20 sps:$4 sm:$0xff]   ;;  %1780 = vmatprep.mubr.bf16.mxu0 %v3792_v6  ;;  %v3793_v21 = vld [vmem:[%s4123_s27 + $0x3c0] ss:$20 sps:$4 sm:$0xff]   ;;  %v3803_v29 = vld [vmem:[%s4123_s27 + $0x28] ss:$20 sps:$4 sm:$0xff]  }
  0x15   : > { %1972 = vmatprep.mubr.bf16.mxu1 %v3795_v8  ;;  %v3799_v24 = vld [vmem:[%s4123_s27 + $0x2c] ss:$20 sps:$4 sm:$0xff]   ;;  %v3804_v30 = vld [vmem:[%s4123_s27 + $0x3e8] ss:$20 sps:$4 sm:$0xff]   ;;  %v3811_v36 = vld [vmem:[%s4123_s27 + $0x50] ss:$20 sps:$4 sm:$0xff]  }
  0x16   : > { %1753 = vmatpush1.bf16.msra.mxu0 %v3776_v3  ;;  %3732 = vmatpush1.bf16.msra.mxu1 %v3776_v3  ;;  %v3801_v25 = vld [vmem:[%s4123_s27 + $0x3ec] ss:$20 sps:$4 sm:$0xff]   ;;  %v3807_v32 = vld [vmem:[%s4123_s27 + $0x54] ss:$20 sps:$4 sm:$0xff]   ;;  %v3812_v37 = vld [vmem:[%s4123_s27 + $0x410] ss:$20 sps:$4 sm:$0xff]  }
  0x17   : > { %1754 = vmatprep.subr.bf16.mxu0 %v4059_v1  ;;  %3717 = vmatprep.subr.bf16.mxu1 %v4059_v1  ;;  %v3809_v33 = vld [vmem:[%s4123_s27 + $0x414] ss:$20 sps:$4 sm:$0xff]   ;;  %v3806_v34 = vld [vmem:[%s5155_s1 + $0xa0] sm:$0xff]   ;;  %v3813_v38 = vld [vmem:[%s5155_s1 + $0x98] sm:$0xff]  }
  0x18   : > { %v3899_v35 = vld [vmem:[%s5155_s1 + $0x108] sm:$0xff]   ;;  %v3815_v39 = vld [vmem:[%s4123_s27 + $0x7c] ss:$20 sps:$4 sm:$0xff]   ;;  %v3823_v45 = vld [vmem:[%s4123_s27 + $0xa4] ss:$20 sps:$4 sm:$0xff]  }
  0x19   : > { %v3817_v40 = vld [vmem:[%s4123_s27 + $0x43c] ss:$20 sps:$4 sm:$0xff]   ;;  %v3819_v42 = vld [vmem:[%s4123_s27 + $0x78] ss:$20 sps:$4 sm:$0xff]   ;;  %v3822_v47 = vld [vmem:[%s5155_s1 + $0x80] sm:$0xff]  }
  0x1a   : > { %1755 = vmatpush1.bf16.msra.mxu0 %v3777_v4  ;;  %3733 = vmatpush1.bf16.msra.mxu1 %v3777_v4  ;;  %v3814_v41 = vld [vmem:[%s5155_s1 + $0x90] sm:$0xff]   ;;  %v3820_v43 = vld [vmem:[%s4123_s27 + $0x438] ss:$20 sps:$4 sm:$0xff]   ;;  %v3930_v48 = vld [vmem:[%s5155_s1 + $0x100] sm:$0xff]  }
  0x1b   : > { %1756 = vmatprep.subr.bf16.mxu0 %v4059_v1  ;;  %3718 = vmatprep.subr.bf16.mxu1 %v4059_v1  ;;  %v3821_v44 = vld [vmem:[%s5155_s1 + $0x88] sm:$0xff]   ;;  %v3825_v46 = vld [vmem:[%s4123_s27 + $0x464] ss:$20 sps:$4 sm:$0xff]   ;;  %v3827_v49 = vld [vmem:[%s4123_s27 + $0xa0] ss:$20 sps:$4 sm:$0xff]  }
  0x1c   : > { %v3828_v50 = vld [vmem:[%s4123_s27 + $0x460] ss:$20 sps:$4 sm:$0xff]   ;;  %v3829_v51 = vld [vmem:[%s5155_s1 + $0xf8] sm:$0xff]   ;;  %v3838_v57 = vld [vmem:[%s5155_s1 + $0xe8] sm:$0xff]  }
  0x1d   : > { %v3831_v52 = vld [vmem:[%s4123_s27 + $0xcc] ss:$20 sps:$4 sm:$0xff]   ;;  %v3830_v54 = vld [vmem:[%s5155_s1 + $0xf0] sm:$0xff]   ;;  %v3836_v55 = vld [vmem:[%s4123_s27 + $0xc8] ss:$20 sps:$4 sm:$0xff]  }
  0x1e   : > { %1757 = vmatpush1.bf16.msra.mxu0 %v3778_v5  ;;  %3734 = vmatpush1.bf16.msra.mxu1 %v3778_v5  ;;  %v3833_v53 = vld [vmem:[%s4123_s27 + $0x48c] ss:$20 sps:$4 sm:$0xff]   ;;  %v3837_v56 = vld [vmem:[%s4123_s27 + $0x488] ss:$20 sps:$4 sm:$0xff]   ;;  %v3844_v61 = vld [vmem:[%s4123_s27 + $0xf0] ss:$20 sps:$4 sm:$0xff]  }
  0x1f   : > { %1758 = vmatprep.subr.bf16.mxu0 %v4059_v1  ;;  %3719 = vmatprep.subr.bf16.mxu1 %v4059_v1  ;;  %v3840_v58 = vld [vmem:[%s4123_s27 + $0xf4] ss:$20 sps:$4 sm:$0xff]   ;;  %v3839_v60 = vld [vmem:[%s5155_s1 + $0xe0] sm:$0xff]   ;;  %v3846_v63 = vld [vmem:[%s5155_s1 + $0xd8] sm:$0xff]  }
  0x20   : > { %v3842_v59 = vld [vmem:[%s4123_s27 + $0x4b4] ss:$20 sps:$4 sm:$0xff]   ;;  %v3845_v62 = vld [vmem:[%s4123_s27 + $0x4b0] ss:$20 sps:$4 sm:$0xff]   ;;  %v3852_v4 = vld [vmem:[%s4123_s27 + $0x118] ss:$20 sps:$4 sm:$0xff]  }
  0x21   : > { %v3848_v0 = vld [vmem:[%s4123_s27 + $0x11c] ss:$20 sps:$4 sm:$0xff]   ;;  %v3853_v5 = vld [vmem:[%s4123_s27 + $0x4d8] ss:$20 sps:$4 sm:$0xff]  }
  0x22   : > { %1759 = vmatpush1.bf16.msra.mxu0 %v3779_v7  ;;  %3735 = vmatpush1.bf16.msra.mxu1 %v3779_v7  ;;  %v3850_v2 = vld [vmem:[%s4123_s27 + $0x4dc] ss:$20 sps:$4 sm:$0xff]   ;;  %v3854_v6 = vld [vmem:[%s5155_s1 + $0xc8] sm:$0xff]   ;;  %v3856_v7 = vld [vmem:[%s4123_s27 + $0x144] ss:$20 sps:$4 sm:$0xff]  }
  0x23   : > { %1760 = vmatprep.subr.bf16.mxu0 %v4059_v1  ;;  %3720 = vmatprep.subr.bf16.mxu1 %v4059_v1  ;;  %v3847_v3 = vld [vmem:[%s5155_s1 + $0xd0] sm:$0xff]   ;;  %v3860_v8 = vld [vmem:[%s4123_s27 + $0xc] ss:$20 sps:$4 sm:$0xff]  }
  0x26   : > { %1761 = vmatpush1.bf16.msra.mxu0 %v3780_v9  ;;  %3736 = vmatpush1.bf16.msra.mxu1 %v3780_v9  ;;  %v3855_v9 = vld [vmem:[%s5155_s1 + $0xc0] sm:$0xff]  }
  0x27   : > { %1762 = vmatprep.subr.bf16.mxu0 %v4059_v1  ;;  %3721 = vmatprep.subr.bf16.mxu1 %v4059_v1 }
  0x2a   : > { %1763 = vmatpush1.bf16.msra.mxu0 %v3781_v10  ;;  %3737 = vmatpush1.bf16.msra.mxu1 %v3781_v10  ;;  %v3858_v10 = vld [vmem:[%s4123_s27 + $0x8] ss:$20 sps:$4 sm:$0xff]  }
  0x2b   : > { %1764 = vmatprep.subr.bf16.mxu0 %v4059_v1  ;;  %3722 = vmatprep.subr.bf16.mxu1 %v4059_v1 }
  0x2e   : > { %1765 = vmatpush2.bf16.msra.mxu0 %v3782_v11  ;;  %3738 = vmatpush2.bf16.msra.mxu1 %v3782_v11  ;;  %v3861_v11 = vld [vmem:[%s4123_s27 + $0x140] ss:$20 sps:$4 sm:$0xff]  }
  0x2f   : > { %1766 = vmatprep.subr.bf16.mxu0 %v4059_v1  ;;  %3723 = vmatprep.subr.bf16.mxu1 %v4059_v1 }
  0x32   : > { %1767 = vmatpush2.bf16.msra.mxu0 %v3783_v12  ;;  %3739 = vmatpush2.bf16.msra.mxu1 %v3783_v12  ;;  %v3862_v12 = vld [vmem:[%s4123_s27 + $0x16c] ss:$20 sps:$4 sm:$0xff]  }
  0x33   : > { %1768 = vmatprep.subr.bf16.mxu0 %v4059_v1  ;;  %3724 = vmatprep.subr.bf16.mxu1 %v4059_v1 }
  0x36   : > { %1769 = vmatpush2.bf16.msra.mxu0 %v3784_v13  ;;  %3740 = vmatpush2.bf16.msra.mxu1 %v3784_v13  ;;  %v3864_v13 = vld [vmem:[%s4123_s27 + $0x34] ss:$20 sps:$4 sm:$0xff]  }
  0x37   : > { %1770 = vmatprep.subr.bf16.mxu0 %v4059_v1  ;;  %3725 = vmatprep.subr.bf16.mxu1 %v4059_v1 }
  0x3a   : > { %1771 = vmatpush2.bf16.msra.mxu0 %v3785_v14  ;;  %3741 = vmatpush2.bf16.msra.mxu1 %v3785_v14  ;;  %v3866_v14 = vld [vmem:[%s4123_s27 + $0x168] ss:$20 sps:$4 sm:$0xff]  }
  0x3b   : > { %1772 = vmatprep.subr.bf16.mxu0 %v4059_v1  ;;  %3726 = vmatprep.subr.bf16.mxu1 %v4059_v1 }
  0x3e   : > { %1773 = vmatpush2.bf16.msra.mxu0 %v3786_v15  ;;  %3742 = vmatpush2.bf16.msra.mxu1 %v3786_v15  ;;  %v3867_v15 = vld [vmem:[%s4123_s27 + $0x30] ss:$20 sps:$4 sm:$0xff]  }
  0x3f   : > { %1774 = vmatprep.subr.bf16.mxu0 %v4059_v1  ;;  %3727 = vmatprep.subr.bf16.mxu1 %v4059_v1 }
  0x42   : > { %1775 = vmatpush2.bf16.msra.mxu0 %v3787_v16  ;;  %3743 = vmatpush2.bf16.msra.mxu1 %v3787_v16  ;;  %v3869_v16 = vld [vmem:[%s4123_s27 + $0x194] ss:$20 sps:$4 sm:$0xff]  }
  0x43   : > { %1776 = vmatprep.subr.bf16.mxu0 %v4059_v1  ;;  %3728 = vmatprep.subr.bf16.mxu1 %v4059_v1 }
  0x46   : > { %1777 = vmatpush2.bf16.msra.mxu0 %v3788_v17  ;;  %3744 = vmatpush2.bf16.msra.mxu1 %v3788_v17  ;;  %v3873_v17 = vld [vmem:[%s4123_s27 + $0x190] ss:$20 sps:$4 sm:$0xff]  }
  0x47   : > { %1778 = vmatprep.subr.bf16.mxu0 %v4059_v1  ;;  %3729 = vmatprep.subr.bf16.mxu1 %v4059_v1 }
  0x4a   : > { %1779 = vmatpush2.bf16.msra.mxu0 %v3789_v18  ;;  %3745 = vmatpush2.bf16.msra.mxu1 %v3789_v18  ;;  %v3874_v18 = vld [vmem:[%s4123_s27 + $0x58] ss:$20 sps:$4 sm:$0xff]  }
  0x4b   : > { %2037 = vmatprep.subr.bf16.mxu1 %v4059_v1  ;;  %3746 = vmatprep.subr.msk.bf16.mxu0 %vm1744_vm0, %v3796_v19  ;;  %v3875_v19 = vld [vmem:[%s4123_s27 + $0x1bc] ss:$20 sps:$4 sm:$0xff]  }
  0x4d   : > { %1781 = vmatmul.mubr.bf16.vlgmr.msra.gmra.mxu0 %v3790_v20  ;;  %1973 = vmatmul.mubr.bf16.vlgmr.msra.gmra.mxu1 %v3793_v21  ;;  %v3877_v20 = vld [vmem:[%s4123_s27 + $0x84] ss:$20 sps:$4 sm:$0xff]  }
  0x4e   : > { %2038 = vmatpush1.bf16.msra.mxu1 %v3797_v22  ;;  %3641 = vmatpush3.bf16.msra.mxu0 %v1746_v23  ;;  %v3879_v21 = vld [vmem:[%s4123_s27 + $0x1b8] ss:$20 sps:$4 sm:$0xff]   ;;  %v3880_v22 = vld [vmem:[%s4123_s27 + $0x80] ss:$20 sps:$4 sm:$0xff]  }
  0x4f   : > { %2039 = vmatprep.subr.bf16.mxu1 %v4059_v1  ;;  %1788 = vmatprep.mubr.bf16.mxu0 %v3799_v24  ;;  %v3881_v23 = vld [vmem:[%s4123_s27 + $0x1e4] ss:$20 sps:$4 sm:$0xff]   ;;  %v3883_v24 = vld [vmem:[%s4123_s27 + $0xac] ss:$20 sps:$4 sm:$0xff]  }
  0x50   : > { %1980 = vmatprep.mubr.bf16.mxu1 %v3801_v25  ;;  %3642 = vmatprep.subr.bf16.mxu0 %v3835_v26  ;;  %v3885_v25 = vld [vmem:[%s4123_s27 + $0x1e0] ss:$20 sps:$4 sm:$0xff]  }
  0x52   : > { %2040 = vmatpush1.bf16.msra.mxu1 %v3798_v27  ;;  %3643 = vmatpush3.bf16.msra.mxu0 %v3835_v26  ;;  %v3886_v26 = vld [vmem:[%s4123_s27 + $0xa8] ss:$20 sps:$4 sm:$0xff]   ;;  %v3887_v27 = vld [vmem:[%s4123_s27 + $0x20c] ss:$20 sps:$4 sm:$0xff]  }
  0x53   : > { %2041 = vmatprep.subr.bf16.mxu1 %v4059_v1  ;;  %3644 = vmatprep.subr.bf16.mxu0 %v3868_v28 }
  0x55   : > { %1789 = vmatmul.mubr.bf16.gmra.mxu0 %v3803_v29  ;;  %1981 = vmatmul.mubr.bf16.gmra.mxu1 %v3804_v30  ;;  %v3891_v29 = vld [vmem:[%s4123_s27 + $0x208] ss:$20 sps:$4 sm:$0xff]   ;;  %v3892_v30 = vld [vmem:[%s4123_s27 + $0xd0] ss:$20 sps:$4 sm:$0xff]  }
  0x56   : > { %2042 = vmatpush1.bf16.msra.mxu1 %v3805_v31  ;;  %1796 = vmatprep.mubr.bf16.mxu0 %v3807_v32  ;;  %v3893_v31 = vld [vmem:[%s4123_s27 + $0x234] ss:$20 sps:$4 sm:$0xff]   ;;  %v3895_v32 = vld [vmem:[%s4123_s27 + $0xfc] ss:$20 sps:$4 sm:$0xff]  }
  0x57   : > { %2043 = vmatprep.subr.bf16.mxu1 %v4059_v1  ;;  %1988 = vmatprep.mubr.bf16.mxu1 %v3809_v33  ;;  %v3897_v33 = vld [vmem:[%s4123_s27 + $0x230] ss:$20 sps:$4 sm:$0xff]  }
  0x58   : > { %3645 = vmatpush3.bf16.msra.mxu0 %v3868_v28  ;;  %v3889_v28 = vld [vmem:[%s4123_s27 + $0xd4] ss:$20 sps:$4 sm:$0xff]  }
  0x59   : > { %3646 = vmatprep.subr.bf16.mxu0 %v3899_v35 }
  0x5a   : > { %2044 = vmatpush1.bf16.msra.mxu1 %v3806_v34  ;;  %v3898_v34 = vld [vmem:[%s4123_s27 + $0xf8] ss:$20 sps:$4 sm:$0xff]  }
  0x5b   : > { %2045 = vmatprep.subr.bf16.mxu1 %v4059_v1 }
  0x5c   : > { %3647 = vmatpush3.bf16.msra.mxu0 %v3899_v35  ;;  %v3900_v35 = vld [vmem:[%s4123_s27 + $0x25c] ss:$20 sps:$4 sm:$0xff]  }
  0x5d   : > { %1797 = vmatmul.mubr.bf16.gmra.mxu0 %v3811_v36  ;;  %1989 = vmatmul.mubr.bf16.gmra.mxu1 %v3812_v37  ;;  %v3902_v36 = vld [vmem:[%s4123_s27 + $0x124] ss:$20 sps:$4 sm:$0xff]  }
  0x5e   : > { %2046 = vmatpush1.bf16.msra.mxu1 %v3813_v38  ;;  %1804 = vmatprep.mubr.bf16.mxu0 %v3815_v39  ;;  %v3904_v37 = vld [vmem:[%s4123_s27 + $0x258] ss:$20 sps:$4 sm:$0xff]   ;;  %v3905_v38 = vld [vmem:[%s4123_s27 + $0x120] ss:$20 sps:$4 sm:$0xff]  }
  0x5f   : > { %2047 = vmatprep.subr.bf16.mxu1 %v4059_v1  ;;  %1996 = vmatprep.mubr.bf16.mxu1 %v3817_v40  ;;  %v3906_v39 = vld [vmem:[%s4123_s27 + $0x284] ss:$20 sps:$4 sm:$0xff]   ;;  %v3908_v40 = vld [vmem:[%s4123_s27 + $0x14c] ss:$20 sps:$4 sm:$0xff]  }
  0x60   : > { %3648 = vmatprep.subr.bf16.mxu0 %v3930_v48 }
  0x61   : > { %3649 = vmatpush3.bf16.msra.mxu0 %v3930_v48  ;;  %v3920_v48 = vld [vmem:[%s4123_s27 + $0x19c] ss:$20 sps:$4 sm:$0xff]  }
  0x62   : > { %2048 = vmatpush1.bf16.msra.mxu1 %v3814_v41  ;;  %v3910_v41 = vld [vmem:[%s4123_s27 + $0x280] ss:$20 sps:$4 sm:$0xff]  }
  0x63   : > { %2049 = vmatprep.subr.bf16.mxu1 %v4059_v1 }
  0x65   : > { %1805 = vmatmul.mubr.bf16.gmra.mxu0 %v3819_v42  ;;  %1997 = vmatmul.mubr.bf16.gmra.mxu1 %v3820_v43  ;;  %v3911_v42 = vld [vmem:[%s4123_s27 + $0x148] ss:$20 sps:$4 sm:$0xff]   ;;  %v3912_v43 = vld [vmem:[%s4123_s27 + $0x2ac] ss:$20 sps:$4 sm:$0xff]  }
  0x66   : > { %2050 = vmatpush1.bf16.msra.mxu1 %v3821_v44  ;;  %1812 = vmatprep.mubr.bf16.mxu0 %v3823_v45  ;;  %v3914_v44 = vld [vmem:[%s4123_s27 + $0x174] ss:$20 sps:$4 sm:$0xff]  }
  0x67   : > { %2051 = vmatprep.subr.bf16.mxu1 %v4059_v1  ;;  %2004 = vmatprep.mubr.bf16.mxu1 %v3825_v46  ;;  %v3916_v45 = vld [vmem:[%s4123_s27 + $0x2a8] ss:$20 sps:$4 sm:$0xff]   ;;  %v3917_v46 = vld [vmem:[%s4123_s27 + $0x170] ss:$20 sps:$4 sm:$0xff]  }
  0x6a   : > { %2052 = vmatpush1.bf16.msra.mxu1 %v3822_v47  ;;  %v3918_v47 = vld [vmem:[%s4123_s27 + $0x2d4] ss:$20 sps:$4 sm:$0xff]  }
  0x6b   : > { %2053 = vmatprep.subr.bf16.mxu1 %v4059_v1 }
  0x6d   : > { %1813 = vmatmul.mubr.bf16.gmra.mxu0 %v3827_v49  ;;  %2005 = vmatmul.mubr.bf16.gmra.mxu1 %v3828_v50  ;;  %v3922_v49 = vld [vmem:[%s4123_s27 + $0x2d0] ss:$20 sps:$4 sm:$0xff]   ;;  %v3923_v50 = vld [vmem:[%s4123_s27 + $0x198] ss:$20 sps:$4 sm:$0xff]  }
  0x6e   : > { %2054 = vmatpush2.bf16.msra.mxu1 %v3829_v51  ;;  %1820 = vmatprep.mubr.bf16.mxu0 %v3831_v52  ;;  %v3924_v51 = vld [vmem:[%s4123_s27 + $0x2fc] ss:$20 sps:$4 sm:$0xff]   ;;  %v3926_v52 = vld [vmem:[%s4123_s27 + $0x1c4] ss:$20 sps:$4 sm:$0xff]  }
  0x6f   : > { %2055 = vmatprep.subr.bf16.mxu1 %v4059_v1  ;;  %2012 = vmatprep.mubr.bf16.mxu1 %v3833_v53  ;;  %v3928_v53 = vld [vmem:[%s4123_s27 + $0x2f8] ss:$20 sps:$4 sm:$0xff]  }
  0x72   : > { %2056 = vmatpush2.bf16.msra.mxu1 %v3830_v54  ;;  %v3929_v54 = vld [vmem:[%s4123_s27 + $0x1c0] ss:$20 sps:$4 sm:$0xff]  }
  0x73   : > { %2057 = vmatprep.subr.bf16.mxu1 %v4059_v1 }
  0x75   : > { %1821 = vmatmul.mubr.bf16.gmra.mxu0 %v3836_v55  ;;  %2013 = vmatmul.mubr.bf16.gmra.mxu1 %v3837_v56  ;;  %v3931_v55 = vld [vmem:[%s4123_s27 + $0x324] ss:$20 sps:$4 sm:$0xff]   ;;  %v3933_v56 = vld [vmem:[%s4123_s27 + $0x1ec] ss:$20 sps:$4 sm:$0xff]  }
  0x76   : > { %2058 = vmatpush2.bf16.msra.mxu1 %v3838_v57  ;;  %1828 = vmatprep.mubr.bf16.mxu0 %v3840_v58  ;;  %v3935_v57 = vld [vmem:[%s4123_s27 + $0x320] ss:$20 sps:$4 sm:$0xff]   ;;  %v3936_v58 = vld [vmem:[%s4123_s27 + $0x1e8] ss:$20 sps:$4 sm:$0xff]  }
  0x77   : > { %2059 = vmatprep.subr.bf16.mxu1 %v4059_v1  ;;  %2020 = vmatprep.mubr.bf16.mxu1 %v3842_v59  ;;  %v3937_v59 = vld [vmem:[%s4123_s27 + $0x34c] ss:$20 sps:$4 sm:$0xff]  }
  0x7a   : > { %2060 = vmatpush2.bf16.msra.mxu1 %v3839_v60  ;;  %v3939_v60 = vld [vmem:[%s4123_s27 + $0x214] ss:$20 sps:$4 sm:$0xff]  }
  0x7b   : > { %2061 = vmatprep.subr.bf16.mxu1 %v4059_v1 }
  0x7d   : > { %1829 = vmatmul.mubr.bf16.gmra.mxu0 %v3844_v61  ;;  %2021 = vmatmul.mubr.bf16.gmra.mxu1 %v3845_v62  ;;  %v3941_v61 = vld [vmem:[%s4123_s27 + $0x348] ss:$20 sps:$4 sm:$0xff]   ;;  %v3942_v62 = vld [vmem:[%s4123_s27 + $0x210] ss:$20 sps:$4 sm:$0xff]  }
  0x7e   : > { %2062 = vmatpush2.bf16.msra.mxu1 %v3846_v63  ;;  %1836 = vmatprep.mubr.bf16.mxu0 %v3848_v0  ;;  %v3943_v63 = vld [vmem:[%s4123_s27 + $0x374] ss:$20 sps:$4 sm:$0xff]   ;;  %v3945_v0 = vld [vmem:[%s4123_s27 + $0x23c] ss:$20 sps:$4 sm:$0xff]  }
  0x7f   : > { %2063 = vmatprep.subr.bf16.mxu1 %v4059_v1  ;;  %2028 = vmatprep.mubr.bf16.mxu1 %v3850_v2  ;;  %v3947_v2 = vld [vmem:[%s4123_s27 + $0x370] ss:$20 sps:$4 sm:$0xff]  }
  0x82   : > { %2064 = vmatpush2.bf16.msra.mxu1 %v3847_v3  ;;  %v3948_v3 = vld [vmem:[%s4123_s27 + $0x238] ss:$20 sps:$4 sm:$0xff]  }
  0x83   : > { %2065 = vmatprep.subr.bf16.mxu1 %v4059_v1 }
  0x85   : > { %1837 = vmatmul.mubr.bf16.gmra.mxu0 %v3852_v4  ;;  %2029 = vmatmul.mubr.bf16.gmra.mxu1 %v3853_v5  ;;  %v3949_v4 = vld [vmem:[%s4123_s27 + $0x39c] ss:$20 sps:$4 sm:$0xff]   ;;  %v3951_v5 = vld [vmem:[%s4123_s27 + $0x264] ss:$20 sps:$4 sm:$0xff]  }
  0x86   : > { %2066 = vmatpush2.bf16.msra.mxu1 %v3854_v6  ;;  %1844 = vmatprep.mubr.bf16.mxu0 %v3856_v7  ;;  %v3953_v6 = vld [vmem:[%s4123_s27 + $0x398] ss:$20 sps:$4 sm:$0xff]   ;;  %v3954_v7 = vld [vmem:[%s4123_s27 + $0x260] ss:$20 sps:$4 sm:$0xff]  }
  0x87   : > { %2067 = vmatprep.subr.bf16.mxu1 %v4059_v1  ;;  %2069 = vmatprep.mubr.bf16.mxu1 %v3860_v8  ;;  %v3871_v1 = vld [vmem:[%s4123_s27 + $0x5c] ss:$20 sps:$4 sm:$0xff]   ;;  %v3955_v8 = vld [vmem:[%s4123_s27 + $0x28c] ss:$20 sps:$4 sm:$0xff]  }
  0x8a   : > { %2068 = vmatpush2.bf16.msra.mxu1 %v3855_v9  ;;  %v3957_v9 = vld [vmem:[%s4123_s27 + $0x10] ss:$20 sps:$4 sm:$0xff]  }
  0x8d   : > { %1845 = vmatmul.mubr.bf16.gmra.mxu0 %v3861_v11  ;;  %2070 = vmatmul.mubr.bf16.vlgmr.msra.gmra.mxu1 %v3858_v10  ;;  %v3958_v10 = vld [vmem:[%s4123_s27 + $0x288] ss:$20 sps:$4 sm:$0xff]   ;;  %v3959_v11 = vld [vmem:[%s4123_s27 + $0x38] ss:$20 sps:$4 sm:$0xff]  }
  0x8e   : > { %1852 = vmatprep.mubr.bf16.mxu0 %v3862_v12  ;;  %2077 = vmatprep.mubr.bf16.mxu1 %v3864_v13  ;;  %v3960_v12 = vld [vmem:[%s4123_s27 + $0x2b4] ss:$20 sps:$4 sm:$0xff]  }
  0x8f   : > { %v3962_v13 = vld [vmem:[%s4123_s27 + $0x60] ss:$20 sps:$4 sm:$0xff]  }
  0x95   : > { %1853 = vmatmul.mubr.bf16.gmra.mxu0 %v3866_v14  ;;  %2078 = vmatmul.mubr.bf16.gmra.mxu1 %v3867_v15 }
  0x96   : > { %1860 = vmatprep.mubr.bf16.mxu0 %v3869_v16  ;;  %2085 = vmatprep.mubr.bf16.mxu1 %v3871_v1 }
  0x9d   : > { %1861 = vmatmul.mubr.bf16.gmra.mxu0 %v3873_v17  ;;  %2086 = vmatmul.mubr.bf16.gmra.mxu1 %v3874_v18 }
  0x9e   : > { %1868 = vmatprep.mubr.bf16.mxu0 %v3875_v19  ;;  %2093 = vmatprep.mubr.bf16.mxu1 %v3877_v20  ;;  %v3963_v19 = vld [vmem:[%s4123_s27 + $0x2b0] ss:$20 sps:$4 sm:$0xff]   ;;  %v3964_v20 = vld [vmem:[%s4123_s27 + $0x88] ss:$20 sps:$4 sm:$0xff]  }
  0xa5   : > { %1869 = vmatmul.mubr.bf16.gmra.mxu0 %v3879_v21  ;;  %2094 = vmatmul.mubr.bf16.gmra.mxu1 %v3880_v22  ;;  %v3965_v21 = vld [vmem:[%s4123_s27 + $0x2dc] ss:$20 sps:$4 sm:$0xff]  }
  0xa6   : > { %1876 = vmatprep.mubr.bf16.mxu0 %v3881_v23  ;;  %2101 = vmatprep.mubr.bf16.mxu1 %v3883_v24  ;;  %v3967_v22 = vld [vmem:[%s4123_s27 + $0xb0] ss:$20 sps:$4 sm:$0xff]  }
  0xad   : > { %1877 = vmatmul.mubr.bf16.gmra.mxu0 %v3885_v25  ;;  %2102 = vmatmul.mubr.bf16.gmra.mxu1 %v3886_v26 }
  0xae   : > { %1884 = vmatprep.mubr.bf16.mxu0 %v3887_v27  ;;  %2109 = vmatprep.mubr.bf16.mxu1 %v3889_v28 }
  0xb5   : > { %1885 = vmatmul.mubr.bf16.gmra.mxu0 %v3891_v29  ;;  %2110 = vmatmul.mubr.bf16.gmra.mxu1 %v3892_v30 }
  0xb6   : > { %1892 = vmatprep.mubr.bf16.mxu0 %v3893_v31  ;;  %2117 = vmatprep.mubr.bf16.mxu1 %v3895_v32  ;;  %v3968_v31 = vld [vmem:[%s4123_s27 + $0x2d8] ss:$20 sps:$4 sm:$0xff]  }
  0xb7   : > { %v3969_v32 = vld [vmem:[%s4123_s27 + $0xd8] ss:$20 sps:$4 sm:$0xff]  }
  0xbd   : > { %1893 = vmatmul.mubr.bf16.gmra.mxu0 %v3897_v33  ;;  %2118 = vmatmul.mubr.bf16.gmra.mxu1 %v3898_v34  ;;  %v3970_v33 = vld [vmem:[%s4123_s27 + $0x304] ss:$20 sps:$4 sm:$0xff]   ;;  %v3972_v34 = vld [vmem:[%s4123_s27 + $0x100] ss:$20 sps:$4 sm:$0xff]  }
  0xbe   : > { %1900 = vmatprep.mubr.bf16.mxu0 %v3900_v35  ;;  %2125 = vmatprep.mubr.bf16.mxu1 %v3902_v36 }
  0xc5   : > { %1901 = vmatmul.mubr.bf16.gmra.mxu0 %v3904_v37  ;;  %2126 = vmatmul.mubr.bf16.gmra.mxu1 %v3905_v38 }
  0xc6   : > { %1908 = vmatprep.mubr.bf16.mxu0 %v3906_v39  ;;  %2133 = vmatprep.mubr.bf16.mxu1 %v3908_v40 }
  0xcd   : > { %1909 = vmatmul.mubr.bf16.gmra.mxu0 %v3910_v41  ;;  %2134 = vmatmul.mubr.bf16.gmra.mxu1 %v3911_v42 }
  0xce   : > { %1916 = vmatprep.mubr.bf16.mxu0 %v3912_v43  ;;  %2141 = vmatprep.mubr.bf16.mxu1 %v3914_v44  ;;  %v3973_v43 = vld [vmem:[%s4123_s27 + $0x300] ss:$20 sps:$4 sm:$0xff]   ;;  %v3974_v44 = vld [vmem:[%s4123_s27 + $0x128] ss:$20 sps:$4 sm:$0xff]  }
  0xd5   : > { %1917 = vmatmul.mubr.bf16.gmra.mxu0 %v3916_v45  ;;  %2142 = vmatmul.mubr.bf16.gmra.mxu1 %v3917_v46  ;;  %v3977_v45 = vld [vmem:[%s4123_s27 + $0x32c] ss:$20 sps:$4 sm:$0xff]   ;;  %v3978_v46 = vld [vmem:[%s4123_s27 + $0x150] ss:$20 sps:$4 sm:$0xff]  }
  0xd6   : > { %1924 = vmatprep.mubr.bf16.mxu0 %v3918_v47  ;;  %2149 = vmatprep.mubr.bf16.mxu1 %v3920_v48 }
  0xdd   : > { %1925 = vmatmul.mubr.bf16.gmra.mxu0 %v3922_v49  ;;  %2150 = vmatmul.mubr.bf16.gmra.mxu1 %v3923_v50 }
  0xde   : > { %1932 = vmatprep.mubr.bf16.mxu0 %v3924_v51  ;;  %2157 = vmatprep.mubr.bf16.mxu1 %v3926_v52 }
  0xe5   : > { %1933 = vmatmul.mubr.bf16.gmra.mxu0 %v3928_v53  ;;  %2158 = vmatmul.mubr.bf16.gmra.mxu1 %v3929_v54 }
  0xe6   : > { %1940 = vmatprep.mubr.bf16.mxu0 %v3931_v55  ;;  %2165 = vmatprep.mubr.bf16.mxu1 %v3933_v56  ;;  %v3975_v55 = vld [vmem:[%s4123_s27 + $0x328] ss:$20 sps:$4 sm:$0xff]   ;;  %v3979_v56 = vld [vmem:[%s4123_s27 + $0x178] ss:$20 sps:$4 sm:$0xff]  }
  0xed   : > { %1941 = vmatmul.mubr.bf16.gmra.mxu0 %v3935_v57  ;;  %2166 = vmatmul.mubr.bf16.gmra.mxu1 %v3936_v58  ;;  %v3982_v57 = vld [vmem:[%s4123_s27 + $0x354] ss:$20 sps:$4 sm:$0xff]  }
  0xee   : > { %1948 = vmatprep.mubr.bf16.mxu0 %v3937_v59  ;;  %2173 = vmatprep.mubr.bf16.mxu1 %v3939_v60  ;;  %v3983_v58 = vld [vmem:[%s4123_s27 + $0x1a0] ss:$20 sps:$4 sm:$0xff]  }
  0xf5   : > { %1949 = vmatmul.mubr.bf16.gmra.mxu0 %v3941_v61  ;;  %2174 = vmatmul.mubr.bf16.gmra.mxu1 %v3942_v62 }
  0xf6   : > { %1956 = vmatprep.mubr.bf16.mxu0 %v3943_v63  ;;  %2181 = vmatprep.mubr.bf16.mxu1 %v3945_v0 }
  0xfd   : > { %1957 = vmatmul.mubr.bf16.gmra.mxu0 %v3947_v2  ;;  %2182 = vmatmul.mubr.bf16.gmra.mxu1 %v3948_v3 }
  0xfe   : > { %1964 = vmatprep.mubr.bf16.mxu0 %v3949_v4  ;;  %2189 = vmatprep.mubr.bf16.mxu1 %v3951_v5  ;;  %v3980_v4 = vld [vmem:[%s4123_s27 + $0x350] ss:$20 sps:$4 sm:$0xff]   ;;  %v3984_v5 = vld [vmem:[%s4123_s27 + $0x1c8] ss:$20 sps:$4 sm:$0xff]  }
 0x105   : > { %1965 = vmatmul.mubr.bf16.gmra.mxu0 %v3953_v6  ;;  %2190 = vmatmul.mubr.bf16.gmra.mxu1 %v3954_v7  ;;  %v3987_v6 = vld [vmem:[%s4123_s27 + $0x37c] ss:$20 sps:$4 sm:$0xff]  }
 0x106   : > { %2197 = vmatprep.mubr.bf16.mxu1 %v3955_v8  ;;  %3650 = vmatprep.mubr.msk.bf16.mxu0 %vm1647_vm1, %v3957_v9  ;;  %v3988_v7 = vld [vmem:[%s4123_s27 + $0x1f0] ss:$20 sps:$4 sm:$0xff]  }
 0x10d   : > { %v4364_v14 = vpop.f32.mrf.mxu0  ;;  %v4366_v15 = vpop.f32.mrf.mxu1  ;;  %2198 = vmatmul.mubr.bf16.gmra.mxu1 %v3958_v10  ;;  %3651 = vmatmul.mubr.msk.bf16.vlgmr.msra.gmra.mxu0 %vm1647_vm1, %v3959_v11 }
 0x10e   : > { %5157 = vst [vmem:[#allocation3_spill] sm:$0xff] %v4366_v15  ;;  %2205 = vmatprep.mubr.bf16.mxu1 %v3960_v12  ;;  %3654 = vmatprep.mubr.msk.bf16.mxu0 %vm1647_vm1, %v3962_v13 }
 0x10f   : > { %v1784_v16 = vpop.f32.mrf.mxu0  ;;  %v1976_v1 = vpop.f32.mrf.mxu1 }
 0x111   : > { %v4370_v17 = vpop.f32.mrf.mxu0  ;;  %v4372_v18 = vpop.f32.mrf.mxu1 }
 0x112   : > { %5158 = vst [vmem:[#allocation4_spill] sm:$0xff] %v4372_v18 }
 0x113   : > { %v1787_v23 = vpop.f32.mrf.mxu0  ;;  %v1979_v24 = vpop.f32.mrf.mxu1 }
 0x115   : > { %v4378_v25 = vpop.f32.mrf.mxu0  ;;  %v4380_v26 = vpop.f32.mrf.mxu1  ;;  %2206 = vmatmul.mubr.bf16.gmra.mxu1 %v3963_v19  ;;  %3655 = vmatmul.mubr.msk.bf16.gmra.mxu0 %vm1647_vm1, %v3964_v20  ;;  %v3985_v19 = vld [vmem:[%s4123_s27 + $0x378] ss:$20 sps:$4 sm:$0xff]  }
 0x116   : > { %5159 = vst [vmem:[#allocation5_spill] sm:$0xff] %v4380_v26  ;;  %2213 = vmatprep.mubr.bf16.mxu1 %v3965_v21  ;;  %3658 = vmatprep.mubr.msk.bf16.mxu0 %vm1647_vm1, %v3967_v22  ;;  %v3989_v20 = vld [vmem:[%s4123_s27 + $0x218] ss:$20 sps:$4 sm:$0xff]   ;;  %v3993_v22 = vld [vmem:[%s4123_s27 + $0x240] ss:$20 sps:$4 sm:$0xff]  }
 0x117   : > { %v1792_v27 = vpop.f32.mrf.mxu0  ;;  %v1984_v28 = vpop.f32.mrf.mxu1  ;;  %v3992_v21 = vld [vmem:[%s4123_s27 + $0x3a4] ss:$20 sps:$4 sm:$0xff]  }
 0x119   : > { %v4384_v29 = vpop.f32.mrf.mxu0  ;;  %v4386_v30 = vpop.f32.mrf.mxu1 }
 0x11a   : > { %5160 = vst [vmem:[#allocation6_spill] sm:$0xff] %v4386_v30 }
 0x11b   : > { %v1795_v35 = vpop.f32.mrf.mxu0  ;;  %v1987_v36 = vpop.f32.mrf.mxu1 }
 0x11c   : > { %v3990_v35 = vld [vmem:[%s4123_s27 + $0x3a0] ss:$20 sps:$4 sm:$0xff]   ;;  %v3994_v36 = vld [vmem:[%s4123_s27 + $0x268] ss:$20 sps:$4 sm:$0xff]  }
 0x11d   : > { %v4392_v37 = vpop.f32.mrf.mxu0  ;;  %v4394_v38 = vpop.f32.mrf.mxu1  ;;  %2214 = vmatmul.mubr.bf16.gmra.mxu1 %v3968_v31  ;;  %3659 = vmatmul.mubr.msk.bf16.gmra.mxu0 %vm1647_vm1, %v3969_v32 }
 0x11e   : > { %5161 = vst [vmem:[#allocation7_spill] sm:$0xff] %v4394_v38  ;;  %2221 = vmatprep.mubr.bf16.mxu1 %v3970_v33  ;;  %3662 = vmatprep.mubr.msk.bf16.mxu0 %vm1647_vm1, %v3972_v34 }
 0x11f   : > { %v1800_v39 = vpop.f32.mrf.mxu0  ;;  %v1992_v40 = vpop.f32.mrf.mxu1 }
 0x120   : > { %v3997_v39 = vld [vmem:[%s4123_s27 + $0x3cc] ss:$20 sps:$4 sm:$0xff]   ;;  %v3998_v40 = vld [vmem:[%s4123_s27 + $0x290] ss:$20 sps:$4 sm:$0xff]  }
 0x121   : > { %v4398_v41 = vpop.f32.mrf.mxu0  ;;  %v4400_v42 = vpop.f32.mrf.mxu1 }
 0x122   : > { %5162 = vst [vmem:[#allocation8_spill] sm:$0xff] %v4400_v42 }
 0x123   : > { %v1803_v47 = vpop.f32.mrf.mxu0  ;;  %v1995_v48 = vpop.f32.mrf.mxu1 }
 0x125   : > { %v4406_v49 = vpop.f32.mrf.mxu0  ;;  %v4408_v50 = vpop.f32.mrf.mxu1  ;;  %2222 = vmatmul.mubr.bf16.gmra.mxu1 %v3973_v43  ;;  %3663 = vmatmul.mubr.msk.bf16.gmra.mxu0 %vm1647_vm1, %v3974_v44 }
 0x126   : > { %5163 = vst [vmem:[#allocation9_spill] sm:$0xff] %v4408_v50  ;;  %2229 = vmatprep.mubr.bf16.mxu1 %v3977_v45  ;;  %3666 = vmatprep.mubr.msk.bf16.mxu0 %vm1647_vm1, %v3978_v46 }
 0x127   : > { %v1808_v51 = vpop.f32.mrf.mxu0  ;;  %v2000_v52 = vpop.f32.mrf.mxu1 }
 0x128   : > { %v4060_v51 = vmov 0.0  }
 0x129   : > { %v4412_v53 = vpop.f32.mrf.mxu0  ;;  %v4414_v54 = vpop.f32.mrf.mxu1  ;;  %234 = vst.msk [vmem:[#allocation2 + $0x10] sm:$0xff] %vm231_vm2, %v4060_v51  ;;  %232 = vst.msk [vmem:[#allocation2] sm:$0xff] %vm231_vm2, %v4060_v51 }
 0x12a   : > { %5164 = vst [vmem:[#allocation10_spill] sm:$0xff] %v4414_v54  ;;  %233 = vst.msk [vmem:[#allocation2 + $0x8] sm:$0xff] %vm231_vm2, %v4060_v51 }
 0x12b   : > { %v1811_v59 = vpop.f32.mrf.mxu0  ;;  %v2003_v60 = vpop.f32.mrf.mxu1  ;;  %235 = vst.msk [vmem:[#allocation2 + $0x18] sm:$0xff] %vm231_vm2, %v4060_v51  ;;  %236 = vst.msk [vmem:[#allocation2 + $0x20] sm:$0xff] %vm231_vm2, %v4060_v51 }
 0x12c   : > { %237 = vst.msk [vmem:[#allocation2 + $0x28] sm:$0xff] %vm231_vm2, %v4060_v51  ;;  %238 = vst.msk [vmem:[#allocation2 + $0x30] sm:$0xff] %vm231_vm2, %v4060_v51  ;;  %v4003_v59 = vld [vmem:[%s4123_s27 + $0x2e0] ss:$20 sps:$4 sm:$0xff]  }
 0x12d   : > { %v4420_v61 = vpop.f32.mrf.mxu0  ;;  %v4422_v62 = vpop.f32.mrf.mxu1  ;;  %2230 = vmatmul.mubr.bf16.gmra.mxu1 %v3975_v55  ;;  %3667 = vmatmul.mubr.msk.bf16.gmra.mxu0 %vm1647_vm1, %v3979_v56  ;;  %239 = vst.msk [vmem:[#allocation2 + $0x38] sm:$0xff] %vm231_vm2, %v4060_v51  ;;  %240 = vst.msk [vmem:[#allocation2 + $0x40] sm:$0xff] %vm231_vm2, %v4060_v51  ;;  %v3995_v56 = vld [vmem:[%s4123_s27 + $0x3c8] ss:$20 sps:$4 sm:$0xff]  }
 0x12e   : > { %5165 = vst [vmem:[#allocation11_spill] sm:$0xff] %v4422_v62  ;;  %2237 = vmatprep.mubr.bf16.mxu1 %v3982_v57  ;;  %3670 = vmatprep.mubr.msk.bf16.mxu0 %vm1647_vm1, %v3983_v58  ;;  %241 = vst.msk [vmem:[#allocation2 + $0x48] sm:$0xff] %vm231_vm2, %v4060_v51  ;;  %v3999_v57 = vld [vmem:[%s4123_s27 + $0x2b8] ss:$20 sps:$4 sm:$0xff]   ;;  %v4002_v58 = vld [vmem:[%s4123_s27 + $0x3f4] ss:$20 sps:$4 sm:$0xff]  }
 0x12f   : > { %v1816_v63 = vpop.f32.mrf.mxu0  ;;  %v2008_v0 = vpop.f32.mrf.mxu1  ;;  %242 = vst.msk [vmem:[#allocation2 + $0x50] sm:$0xff] %vm231_vm2, %v4060_v51  ;;  %243 = vst.msk [vmem:[#allocation2 + $0x58] sm:$0xff] %vm231_vm2, %v4060_v51 }
 0x130   : > { %244 = vst.msk [vmem:[#allocation2 + $0x60] sm:$0xff] %vm231_vm2, %v4060_v51  ;;  %245 = vst.msk [vmem:[#allocation2 + $0x68] sm:$0xff] %vm231_vm2, %v4060_v51  ;;  %v298_v50 = vld [vmem:[#allocation2 + $0x10] sm:$0xff] }
 0x131   : > { %v4426_v2 = vpop.f32.mrf.mxu0  ;;  %v4428_v3 = vpop.f32.mrf.mxu1  ;;  %246 = vst.msk [vmem:[#allocation2 + $0x70] sm:$0xff] %vm231_vm2, %v4060_v51  ;;  %247 = vst.msk [vmem:[#allocation2 + $0x78] sm:$0xff] %vm231_vm2, %v4060_v51 }
 0x132   : > { %5166 = vst [vmem:[#allocation12_spill] sm:$0xff] %v4428_v3  ;;  %248 = vst.msk [vmem:[#allocation2 + $0x80] sm:$0xff] %vm231_vm2, %v4060_v51  ;;  %v299_v26 = vld [vmem:[#allocation2 + $0x18] sm:$0xff] }
 0x133   : > { %v1819_v8 = vpop.f32.mrf.mxu0  ;;  %v2011_v9 = vpop.f32.mrf.mxu1  ;;  %249 = vst.msk [vmem:[#allocation2 + $0x88] sm:$0xff] %vm231_vm2, %v4060_v51  ;;  %250 = vst.msk [vmem:[#allocation2 + $0x90] sm:$0xff] %vm231_vm2, %v4060_v51 }
 0x134   : > { %251 = vst.msk [vmem:[#allocation2 + $0x98] sm:$0xff] %vm231_vm2, %v4060_v51  ;;  %252 = vst.msk [vmem:[#allocation2 + $0xa0] sm:$0xff] %vm231_vm2, %v4060_v51 }
 0x135   : > { %v4434_v10 = vpop.f32.mrf.mxu0  ;;  %v4436_v11 = vpop.f32.mrf.mxu1  ;;  %2238 = vmatmul.mubr.bf16.gmra.mxu1 %v3980_v4  ;;  %3671 = vmatmul.mubr.msk.bf16.gmra.mxu0 %vm1647_vm1, %v3984_v5  ;;  %253 = vst.msk [vmem:[#allocation2 + $0xa8] sm:$0xff] %vm231_vm2, %v4060_v51  ;;  %254 = vst.msk [vmem:[#allocation2 + $0xb0] sm:$0xff] %vm231_vm2, %v4060_v51 }
 0x136   : > { %5167 = vst [vmem:[#allocation13_spill] sm:$0xff] %v4436_v11  ;;  %2245 = vmatprep.mubr.bf16.mxu1 %v3987_v6  ;;  %3674 = vmatprep.mubr.msk.bf16.mxu0 %vm1647_vm1, %v3988_v7  ;;  %255 = vst.msk [vmem:[#allocation2 + $0xb8] sm:$0xff] %vm231_vm2, %v4060_v51 }
 0x137   : > { %v1824_v12 = vpop.f32.mrf.mxu0  ;;  %v2016_v13 = vpop.f32.mrf.mxu1  ;;  %256 = vst.msk [vmem:[#allocation2 + $0xc0] sm:$0xff] %vm231_vm2, %v4060_v51  ;;  %257 = vst.msk [vmem:[#allocation2 + $0xc8] sm:$0xff] %vm231_vm2, %v4060_v51 }
 0x138   : > { %258 = vst.msk [vmem:[#allocation2 + $0xd0] sm:$0xff] %vm231_vm2, %v4060_v51  ;;  %259 = vst.msk [vmem:[#allocation2 + $0xd8] sm:$0xff] %vm231_vm2, %v4060_v51  ;;  %v4000_v12 = vld [vmem:[%s4123_s27 + $0x3f0] ss:$20 sps:$4 sm:$0xff]   ;;  %v4004_v13 = vld [vmem:[%s4123_s27 + $0x308] ss:$20 sps:$4 sm:$0xff]  }
 0x139   : > { %v4440_v16 = vpop.f32.mrf.mxu0  ;;  %v4442_v1 = vpop.f32.mrf.mxu1  ;;  %260 = vst.msk [vmem:[#allocation2 + $0xe0] sm:$0xff] %vm231_vm2, %v4060_v51  ;;  %261 = vst.msk [vmem:[#allocation2 + $0xe8] sm:$0xff] %vm231_vm2, %v4060_v51 }
 0x13a   : > { %5168 = vst [vmem:[#allocation14_spill] sm:$0xff] %v4442_v1  ;;  %262 = vst.msk [vmem:[#allocation2 + $0xf0] sm:$0xff] %vm231_vm2, %v4060_v51 }
 0x13b   : > { %v1827_v23 = vpop.f32.mrf.mxu0  ;;  %v2019_v24 = vpop.f32.mrf.mxu1  ;;  %263 = vst.msk [vmem:[#allocation2 + $0xf8] sm:$0xff] %vm231_vm2, %v4060_v51  ;;  %264 = vst.msk [vmem:[#allocation2 + $0x100] sm:$0xff] %vm231_vm2, %v4060_v51 }
 0x13c   : > { %265 = vst.msk [vmem:[#allocation2 + $0x108] sm:$0xff] %vm231_vm2, %v4060_v51  ;;  %266 = vst.msk [vmem:[#allocation2 + $0x110] sm:$0xff] %vm231_vm2, %v4060_v51 }
 0x13d   : > { %v4448_v27 = vpop.f32.mrf.mxu0  ;;  %v4450_v28 = vpop.f32.mrf.mxu1  ;;  %2246 = vmatmul.mubr.bf16.gmra.mxu1 %v3985_v19  ;;  %3675 = vmatmul.mubr.msk.bf16.gmra.mxu0 %vm1647_vm1, %v3989_v20  ;;  %267 = vst.msk [vmem:[#allocation2 + $0x118] sm:$0xff] %vm231_vm2, %v4060_v51  ;;  %268 = vst.msk [vmem:[#allocation2 + $0x120] sm:$0xff] %vm231_vm2, %v4060_v51  ;;  %v4007_v20 = vld [vmem:[%s4123_s27 + $0x41c] ss:$20 sps:$4 sm:$0xff]  }
 0x13e   : > { %5169 = vst [vmem:[#allocation15_spill] sm:$0xff] %v4450_v28  ;;  %2253 = vmatprep.mubr.bf16.mxu1 %v3992_v21  ;;  %3678 = vmatprep.mubr.msk.bf16.mxu0 %vm1647_vm1, %v3993_v22  ;;  %269 = vst.msk [vmem:[#allocation2 + $0x128] sm:$0xff] %vm231_vm2, %v4060_v51  ;;  %v4008_v21 = vld [vmem:[%s4123_s27 + $0x330] ss:$20 sps:$4 sm:$0xff]  }
 0x13f   : > { %v1832_v31 = vpop.f32.mrf.mxu0  ;;  %v2024_v32 = vpop.f32.mrf.mxu1  ;;  %270 = vst.msk [vmem:[#allocation2 + $0x130] sm:$0xff] %vm231_vm2, %v4060_v51  ;;  %271 = vst.msk [vmem:[#allocation2 + $0x138] sm:$0xff] %vm231_vm2, %v4060_v51 }
 0x140   : > { %272 = vst.msk [vmem:[#allocation2 + $0x140] sm:$0xff] %vm231_vm2, %v4060_v51  ;;  %273 = vst.msk [vmem:[#allocation2 + $0x148] sm:$0xff] %vm231_vm2, %v4060_v51 }
 0x141   : > { %v4454_v33 = vpop.f32.mrf.mxu0  ;;  %v4456_v34 = vpop.f32.mrf.mxu1  ;;  %274 = vst.msk [vmem:[#allocation2 + $0x150] sm:$0xff] %vm231_vm2, %v4060_v51  ;;  %275 = vst.msk [vmem:[#allocation2 + $0x158] sm:$0xff] %vm231_vm2, %v4060_v51 }
 0x142   : > { %5170 = vst [vmem:[#allocation16_spill] sm:$0xff] %v4456_v34  ;;  %276 = vst.msk [vmem:[#allocation2 + $0x160] sm:$0xff] %vm231_vm2, %v4060_v51 }
 0x143   : > { %v1835_v43 = vpop.f32.mrf.mxu0  ;;  %v2027_v44 = vpop.f32.mrf.mxu1  ;;  %277 = vst.msk [vmem:[#allocation2 + $0x168] sm:$0xff] %vm231_vm2, %v4060_v51  ;;  %278 = vst.msk [vmem:[#allocation2 + $0x170] sm:$0xff] %vm231_vm2, %v4060_v51 }
 0x144   : > { %279 = vst.msk [vmem:[#allocation2 + $0x178] sm:$0xff] %vm231_vm2, %v4060_v51  ;;  %280 = vst.msk [vmem:[#allocation2 + $0x180] sm:$0xff] %vm231_vm2, %v4060_v51  ;;  %v4012_v44 = vld [vmem:[%s4123_s27 + $0x444] ss:$20 sps:$4 sm:$0xff]  }
 0x145   : > { %v4462_v45 = vpop.f32.mrf.mxu0  ;;  %v4464_v46 = vpop.f32.mrf.mxu1  ;;  %2254 = vmatmul.mubr.bf16.gmra.mxu1 %v3990_v35  ;;  %3679 = vmatmul.mubr.msk.bf16.gmra.mxu0 %vm1647_vm1, %v3994_v36  ;;  %281 = vst.msk [vmem:[#allocation2 + $0x188] sm:$0xff] %vm231_vm2, %v4060_v51  ;;  %282 = vst.msk [vmem:[#allocation2 + $0x190] sm:$0xff] %vm231_vm2, %v4060_v51 }
 0x146   : > { %5171 = vst [vmem:[#allocation17_spill] sm:$0xff] %v4464_v46  ;;  %2261 = vmatprep.mubr.bf16.mxu1 %v3997_v39  ;;  %3682 = vmatprep.mubr.msk.bf16.mxu0 %vm1647_vm1, %v3998_v40  ;;  %283 = vst.msk [vmem:[#allocation2 + $0x198] sm:$0xff] %vm231_vm2, %v4060_v51  ;;  %v4005_v39 = vld [vmem:[%s4123_s27 + $0x418] ss:$20 sps:$4 sm:$0xff]  }
 0x147   : > { %v1840_v47 = vpop.f32.mrf.mxu0  ;;  %v2032_v48 = vpop.f32.mrf.mxu1  ;;  %284 = vst.msk [vmem:[#allocation2 + $0x1a0] sm:$0xff] %vm231_vm2, %v4060_v51  ;;  %285 = vst.msk [vmem:[#allocation2 + $0x1a8] sm:$0xff] %vm231_vm2, %v4060_v51  ;;  %v4009_v40 = vld [vmem:[%s4123_s27 + $0x358] ss:$20 sps:$4 sm:$0xff]  }
 0x148   : > { %286 = vst.msk [vmem:[#allocation2 + $0x1b0] sm:$0xff] %vm231_vm2, %v4060_v51  ;;  %287 = vst.msk [vmem:[#allocation2 + $0x1b8] sm:$0xff] %vm231_vm2, %v4060_v51  ;;  %v4013_v47 = vld [vmem:[%s4123_s27 + $0x380] ss:$20 sps:$4 sm:$0xff]  }
 0x149   : > { %288 = vst.msk [vmem:[#allocation2 + $0x1c0] sm:$0xff] %vm231_vm2, %v4060_v51  ;;  %289 = vst.msk [vmem:[#allocation2 + $0x1c8] sm:$0xff] %vm231_vm2, %v4060_v51  ;;  %v4596_v52 = vpop.f32.mrf.mxu0  ;;  %v4598_v55 = vpop.f32.mrf.mxu1 }
 0x14a   : > { %290 = vst.msk [vmem:[#allocation2 + $0x1d0] sm:$0xff] %vm231_vm2, %v4060_v51  ;;  %291 = vst.msk [vmem:[#allocation2 + $0x1d8] sm:$0xff] %vm231_vm2, %v4060_v51 }
 0x14b   : > { %292 = vst.msk [vmem:[#allocation2 + $0x1e0] sm:$0xff] %vm231_vm2, %v4060_v51  ;;  %293 = vst.msk [vmem:[#allocation2 + $0x1e8] sm:$0xff] %vm231_vm2, %v4060_v51  ;;  %v1843_v60 = vpop.f32.mrf.mxu0  ;;  %v2035_v63 = vpop.f32.mrf.mxu1 }
 0x14c   : > { %294 = vst.msk [vmem:[#allocation2 + $0x1f0] sm:$0xff] %vm231_vm2, %v4060_v51  ;;  %295 = vst.msk [vmem:[#allocation2 + $0x1f8] sm:$0xff] %vm231_vm2, %v4060_v51  ;;  %v4010_v63 = vld [vmem:[%s4123_s27 + $0x440] ss:$20 sps:$4 sm:$0xff]  }
 0x14d   : > { %5172 = vst [vmem:[#allocation18_spill] sm:$0xff] %v4598_v55  ;;  %v4604_v0 = vpop.f32.mrf.mxu0  ;;  %v2071_v4 = vpop.f32.mrf.mxu1  ;;  %2262 = vmatmul.mubr.bf16.gmra.mxu1 %v3995_v56  ;;  %3683 = vmatmul.mubr.msk.bf16.gmra.mxu0 %vm1647_vm1, %v3999_v57 }
 0x14e   : > { %v4608_v5 = vadd.f32 %v2071_v4, %v4364_v14  ;;  %2269 = vmatprep.mubr.bf16.mxu1 %v4002_v58  ;;  %3686 = vmatprep.mubr.msk.bf16.mxu0 %vm1647_vm1, %v4003_v59  ;;  %v4014_v4 = vld [vmem:[%s4123_s27 + $0x3a8] ss:$20 sps:$4 sm:$0xff]  }
 0x14f   : > { %v1848_v6 = vpop.f32.mrf.mxu0  ;;  %v2073_v7 = vpop.f32.mrf.mxu1 }
 0x150   : > { %v4017_v7 = vld [vmem:[%s4123_s27 + $0x46c] ss:$20 sps:$4 sm:$0xff]  }
 0x151   : > { %v4611_v8 = vpop.f32.mrf.mxu0  ;;  %v2074_v9 = vpop.f32.mrf.mxu1 }
 0x152   : > { %v4616_v19 = vadd.f32 %v2074_v9, %v4370_v17  ;;  %v4018_v9 = vld [vmem:[%s4123_s27 + $0x3d0] ss:$20 sps:$4 sm:$0xff]  }
 0x153   : > { %v1851_v22 = vpop.f32.mrf.mxu0  ;;  %v2076_v14 = vpop.f32.mrf.mxu1 }
 0x155   : > { %v4620_v23 = vpop.f32.mrf.mxu0  ;;  %v2079_v24 = vpop.f32.mrf.mxu1  ;;  %2270 = vmatmul.mubr.bf16.gmra.mxu1 %v4000_v12  ;;  %3687 = vmatmul.mubr.msk.bf16.gmra.mxu0 %vm1647_vm1, %v4004_v13 }
 0x156   : > { %v4624_v31 = vadd.f32 %v2079_v24, %v4378_v25  ;;  %2277 = vmatprep.mubr.bf16.mxu1 %v4007_v20  ;;  %3690 = vmatprep.mubr.msk.bf16.mxu0 %vm1647_vm1, %v4008_v21 }
 0x157   : > { %v1856_v17 = vpop.f32.mrf.mxu0  ;;  %v2081_v32 = vpop.f32.mrf.mxu1 }
 0x158   : > { %v4015_v17 = vld [vmem:[%s4123_s27 + $0x468] ss:$20 sps:$4 sm:$0xff]   ;;  %v4019_v32 = vld [vmem:[%s4123_s27 + $0x3f8] ss:$20 sps:$4 sm:$0xff]  }
 0x159   : > { %v4627_v35 = vpop.f32.mrf.mxu0  ;;  %v2082_v36 = vpop.f32.mrf.mxu1 }
 0x15a   : > { %v4632_v43 = vadd.f32 %v2082_v36, %v4384_v29 }
 0x15b   : > { %v1859_v48 = vpop.f32.mrf.mxu0  ;;  %v2084_v25 = vpop.f32.mrf.mxu1 }
 0x15d   : > { %v4636_v51 = vpop.f32.mrf.mxu0  ;;  %v2087_v56 = vpop.f32.mrf.mxu1  ;;  %2278 = vmatmul.mubr.bf16.gmra.mxu1 %v4005_v39  ;;  %3691 = vmatmul.mubr.msk.bf16.gmra.mxu0 %vm1647_vm1, %v4009_v40  ;;  %v4022_v39 = vld [vmem:[%s4123_s27 + $0x494] ss:$20 sps:$4 sm:$0xff]  }
 0x15e   : > { %v4640_v57 = vadd.f32 %v2087_v56, %v4392_v37  ;;  %2285 = vmatprep.mubr.bf16.mxu1 %v4012_v44  ;;  %3694 = vmatprep.mubr.msk.bf16.mxu0 %vm1647_vm1, %v4013_v47  ;;  %v4023_v40 = vld [vmem:[%s4123_s27 + $0x420] ss:$20 sps:$4 sm:$0xff]  }
 0x15f   : > { %v1864_v29 = vpop.f32.mrf.mxu0  ;;  %v2089_v58 = vpop.f32.mrf.mxu1 }
 0x161   : > { %v4643_v59 = vpop.f32.mrf.mxu0  ;;  %v2090_v60 = vpop.f32.mrf.mxu1 }
 0x162   : > { %v4648_v6 = vadd.f32 %v2090_v60, %v4398_v41  ;;  %v4020_v60 = vld [vmem:[%s4123_s27 + $0x490] ss:$20 sps:$4 sm:$0xff]  }
 0x163   : > { %v1867_v12 = vpop.f32.mrf.mxu0  ;;  %v2092_v37 = vpop.f32.mrf.mxu1 }
 0x165   : > { %v4652_v13 = vpop.f32.mrf.mxu0  ;;  %v2095_v20 = vpop.f32.mrf.mxu1  ;;  %2286 = vmatmul.mubr.bf16.gmra.mxu1 %v4010_v63  ;;  %3695 = vmatmul.mubr.msk.bf16.gmra.mxu0 %vm1647_vm1, %v4014_v4  ;;  %v4024_v63 = vld [vmem:[%s4123_s27 + $0x448] ss:$20 sps:$4 sm:$0xff]  }
 0x166   : > { %v4656_v21 = vadd.f32 %v2095_v20, %v4406_v49  ;;  %2293 = vmatprep.mubr.bf16.mxu1 %v4017_v7  ;;  %3698 = vmatprep.mubr.msk.bf16.mxu0 %vm1647_vm1, %v4018_v9  ;;  %v4027_v7 = vld [vmem:[%s4123_s27 + $0x4bc] ss:$20 sps:$4 sm:$0xff]  }
 0x167   : > { %v1872_v41 = vpop.f32.mrf.mxu0  ;;  %v2097_v22 = vpop.f32.mrf.mxu1  ;;  %v4028_v9 = vld [vmem:[%s4123_s27 + $0x470] ss:$20 sps:$4 sm:$0xff]  }
 0x169   : > { %v4659_v14 = vpop.f32.mrf.mxu0  ;;  %v2098_v24 = vpop.f32.mrf.mxu1 }
 0x16a   : > { %v4664_v36 = vadd.f32 %v2098_v24, %v4412_v53 }
 0x16b   : > { %v1875_v44 = vpop.f32.mrf.mxu0  ;;  %v2100_v49 = vpop.f32.mrf.mxu1 }
 0x16c   : > { %v4032_v44 = vld [vmem:[%s4123_s27 + $0x4e4] ss:$20 sps:$4 sm:$0xff]   ;;  %v4033_v49 = vld [vmem:[%s4123_s27 + $0x4c0] ss:$20 sps:$4 sm:$0xff]  }
 0x16d   : > { %v4668_v47 = vpop.f32.mrf.mxu0  ;;  %v2103_v48 = vpop.f32.mrf.mxu1  ;;  %2294 = vmatmul.mubr.bf16.gmra.mxu1 %v4015_v17  ;;  %3699 = vmatmul.mubr.msk.bf16.gmra.mxu0 %vm1647_vm1, %v4019_v32  ;;  %v4025_v32 = vld [vmem:[%s4123_s27 + $0x4b8] ss:$20 sps:$4 sm:$0xff]  }
 0x16e   : > { %v4672_v25 = vadd.f32 %v2103_v48, %v4420_v61  ;;  %2301 = vmatprep.mubr.bf16.mxu1 %v4022_v39  ;;  %3702 = vmatprep.mubr.msk.bf16.mxu0 %vm1647_vm1, %v4023_v40  ;;  %v4029_v39 = vld [vmem:[%s4123_s27 + $0x498] ss:$20 sps:$4 sm:$0xff]  }
 0x16f   : > { %v1880_v53 = vpop.f32.mrf.mxu0  ;;  %v2105_v56 = vpop.f32.mrf.mxu1 }
 0x171   : > { %v4675_v29 = vpop.f32.mrf.mxu0  ;;  %v2106_v58 = vpop.f32.mrf.mxu1 }
 0x172   : > { %v4680_v4 = vadd.f32 %v2106_v58, %v4426_v2 }
 0x173   : > { %v1883_v12 = vpop.f32.mrf.mxu0  ;;  %v2108_v61 = vpop.f32.mrf.mxu1 }
 0x174   : > { %v4034_v12 = vld [vmem:[%s4123_s27 + $0x4e8] ss:$20 sps:$4 sm:$0xff]  }
 0x175   : > { %v4684_v37 = vpop.f32.mrf.mxu0  ;;  %v2111_v20 = vpop.f32.mrf.mxu1  ;;  %2302 = vmatmul.mubr.bf16.gmra.mxu1 %v4020_v60  ;;  %3703 = vmatmul.mubr.msk.bf16.gmra.mxu0 %vm1647_vm1, %v4024_v63 }
 0x176   : > { %v4688_v41 = vadd.f32 %v2111_v20, %v4434_v10  ;;  %2309 = vmatprep.mubr.bf16.mxu1 %v4027_v7  ;;  %3706 = vmatprep.mubr.msk.bf16.mxu0 %vm1647_vm1, %v4028_v9  ;;  %v4030_v9 = vld [vmem:[%s4123_s27 + $0x4e0] ss:$20 sps:$4 sm:$0xff]   ;;  %s3243_s27 = sshll.u32 %s5196_s15, 2 }
 0x177   : > { %v1888_v2 = vpop.f32.mrf.mxu0  ;;  %v2113_v22 = vpop.f32.mrf.mxu1  ;;  %s4825_s24 = scalar_lea.vmem %s5156_s2, %s3243_s27 }
 0x179   : > { %v4691_v24 = vpop.f32.mrf.mxu0  ;;  %v2114_v17 = vpop.f32.mrf.mxu1 }
 0x17a   : > { %v4696_v40 = vadd.f32 %v2114_v17, %v4440_v16 }
 0x17b   : > { %v1891_v48 = vpop.f32.mrf.mxu0  ;;  %v2116_v10 = vpop.f32.mrf.mxu1 }
 0x17d   : > { %v4700_v53 = vpop.f32.mrf.mxu0  ;;  %v2119_v56 = vpop.f32.mrf.mxu1  ;;  %2310 = vmatmul.mubr.bf16.gmra.mxu1 %v4025_v32  ;;  %3707 = vmatmul.mubr.msk.bf16.gmra.mxu0 %vm1647_vm1, %v4029_v39 }
 0x17e   : > { %v4704_v58 = vadd.f32 %v2119_v56, %v4448_v27  ;;  %2317 = vmatprep.mubr.bf16.mxu1 %v4032_v44  ;;  %3710 = vmatprep.mubr.msk.bf16.mxu0 %vm1647_vm1, %v4033_v49 }
 0x17f   : > { %v1896_v16 = vpop.f32.mrf.mxu0  ;;  %v2121_v60 = vpop.f32.mrf.mxu1 }
 0x181   : > { %v4707_v63 = vpop.f32.mrf.mxu0  ;;  %v2122_v7 = vpop.f32.mrf.mxu1 }
 0x182   : > { %v4712_v61 = vadd.f32 %v2122_v7, %v4454_v33 }
 0x183   : > { %v1899_v20 = vpop.f32.mrf.mxu0  ;;  %v2124_v2 = vpop.f32.mrf.mxu1 }
 0x185   : > { %v4714_v22 = vpop.f32.mrf.mxu0  ;;  %v2127_v17 = vpop.f32.mrf.mxu1  ;;  %2318 = vmatmul.mubr.bf16.gmra.mxu1 %v4030_v9  ;;  %3711 = vmatmul.mubr.msk.bf16.gmra.mxu0 %vm1647_vm1, %v4034_v12 }
 0x186   : > { %v4718_v27 = vadd.f32 %v2127_v17, %v4462_v45 }
 0x187   : > { %v1904_v32 = vpop.f32.mrf.mxu0  ;;  %v2129_v39 = vpop.f32.mrf.mxu1 }
 0x189   : > { %v4720_v44 = vpop.f32.mrf.mxu0  ;;  %v2130_v49 = vpop.f32.mrf.mxu1 }
 0x18a   : > { %v4723_v48 = vadd.f32 %v2130_v49, %v4596_v52 }
 0x18b   : > { %v1907_v33 = vpop.f32.mrf.mxu0  ;;  %v2132_v10 = vpop.f32.mrf.mxu1 }
 0x18d   : > { %v4725_v56 = vpop.f32.mrf.mxu0  ;;  %v2135_v16 = vpop.f32.mrf.mxu1 }
 0x18e   : > { %v4728_v60 = vadd.f32 %v2135_v16, %v4604_v0 }
 0x18f   : > { %v1912_v7 = vpop.f32.mrf.mxu0  ;;  %v2137_v9 = vpop.f32.mrf.mxu1 }
 0x191   : > { %v4730_v45 = vpop.f32.mrf.mxu0  ;;  %v2138_v12 = vpop.f32.mrf.mxu1 }
 0x192   : > { %v4733_v20 = vadd.f32 %v2138_v12, %v4611_v8 }
 0x193   : > { %v1915_v2 = vpop.f32.mrf.mxu0  ;;  %v2140_v17 = vpop.f32.mrf.mxu1 }
 0x195   : > { %v4735_v52 = vpop.f32.mrf.mxu0  ;;  %v2143_v32 = vpop.f32.mrf.mxu1 }
 0x196   : > { %v4738_v39 = vadd.f32 %v2143_v32, %v4620_v23 }
 0x197   : > { %v1920_v49 = vpop.f32.mrf.mxu0  ;;  %v2145_v33 = vpop.f32.mrf.mxu1 }
 0x199   : > { %v4740_v0 = vpop.f32.mrf.mxu0  ;;  %v2146_v10 = vpop.f32.mrf.mxu1 }
 0x19a   : > { %v4743_v16 = vadd.f32 %v2146_v10, %v4627_v35 }
 0x19b   : > { %v1923_v7 = vpop.f32.mrf.mxu0  ;;  %v2148_v9 = vpop.f32.mrf.mxu1 }
 0x19d   : > { %v4745_v8 = vpop.f32.mrf.mxu0  ;;  %v2151_v12 = vpop.f32.mrf.mxu1 }
 0x19e   : > { %v4748_v2 = vadd.f32 %v2151_v12, %v4636_v51 }
 0x19f   : > { %v1928_v17 = vpop.f32.mrf.mxu0  ;;  %v2153_v55 = vpop.f32.mrf.mxu1 }
 0x1a1   : > { %v4750_v23 = vpop.f32.mrf.mxu0  ;;  %v2154_v32 = vpop.f32.mrf.mxu1 }
 0x1a2   : > { %v4753_v49 = vadd.f32 %v2154_v32, %v4643_v59 }
 0x1a3   : > { %v1931_v33 = vpop.f32.mrf.mxu0  ;;  %v2156_v34 = vpop.f32.mrf.mxu1 }
 0x1a5   : > { %v4755_v35 = vpop.f32.mrf.mxu0  ;;  %v2159_v10 = vpop.f32.mrf.mxu1 }
 0x1a6   : > { %v4758_v7 = vadd.f32 %v2159_v10, %v4652_v13 }
 0x1a7   : > { %v1936_v9 = vpop.f32.mrf.mxu0  ;;  %v2161_v46 = vpop.f32.mrf.mxu1 }
 0x1a9   : > { %v4760_v51 = vpop.f32.mrf.mxu0  ;;  %v2162_v12 = vpop.f32.mrf.mxu1 }
 0x1aa   : > { %v4763_v55 = vadd.f32 %v2162_v12, %v4659_v14 }
 0x1ab   : > { %v1939_v17 = vpop.f32.mrf.mxu0  ;;  %v2164_v28 = vpop.f32.mrf.mxu1 }
 0x1ad   : > { %v4765_v59 = vpop.f32.mrf.mxu0  ;;  %v2167_v32 = vpop.f32.mrf.mxu1 }
 0x1ae   : > { %v4768_v34 = vadd.f32 %v2167_v32, %v4668_v47 }
 0x1af   : > { %v1944_v33 = vpop.f32.mrf.mxu0  ;;  %v2169_v3 = vpop.f32.mrf.mxu1 }
 0x1b1   : > { %v4770_v13 = vpop.f32.mrf.mxu0  ;;  %v2170_v10 = vpop.f32.mrf.mxu1 }
 0x1b2   : > { %v4773_v46 = vadd.f32 %v2170_v10, %v4675_v29 }
 0x1b3   : > { %v1947_v9 = vpop.f32.mrf.mxu0  ;;  %v2172_v1 = vpop.f32.mrf.mxu1 }
 0x1b5   : > { %v4775_v14 = vpop.f32.mrf.mxu0  ;;  %v2175_v12 = vpop.f32.mrf.mxu1 }
 0x1b6   : > { %v4778_v28 = vadd.f32 %v2175_v12, %v4684_v37 }
 0x1b7   : > { %v1952_v17 = vpop.f32.mrf.mxu0  ;;  %v2177_v62 = vpop.f32.mrf.mxu1 }
 0x1b9   : > { %v4780_v47 = vpop.f32.mrf.mxu0  ;;  %v2178_v32 = vpop.f32.mrf.mxu1 }
 0x1ba   : > { %v4783_v3 = vadd.f32 %v2178_v32, %v4691_v24 }
 0x1bb   : > { %v1955_v33 = vpop.f32.mrf.mxu0  ;;  %v2180_v11 = vpop.f32.mrf.mxu1 }
 0x1bd   : > { %v4785_v29 = vpop.f32.mrf.mxu0  ;;  %v2183_v10 = vpop.f32.mrf.mxu1 }
 0x1be   : > { %v4788_v1 = vadd.f32 %v2183_v10, %v4700_v53 }
 0x1bf   : > { %v1960_v9 = vpop.f32.mrf.mxu0  ;;  %v2185_v42 = vpop.f32.mrf.mxu1 }
 0x1c1   : > { %v4790_v37 = vpop.f32.mrf.mxu0  ;;  %v2186_v12 = vpop.f32.mrf.mxu1 }
 0x1c2   : > { %5173 = vst [vmem:[#allocation19_spill] sm:$0xff] %v4790_v37  ;;  %v4793_v62 = vadd.f32 %v2186_v12, %v4707_v63 }
 0x1c3   : > { %v1963_v17 = vpop.f32.mrf.mxu0  ;;  %v2188_v54 = vpop.f32.mrf.mxu1 }
 0x1c4   : > { %v296_v17 = vld [vmem:[#allocation2] sm:$0xff] }
 0x1c5   : > { %v4795_v24 = vpop.f32.mrf.mxu0  ;;  %v4797_v32 = vpop.f32.mrf.mxu1 }
 0x1c7   : > { %v1968_v11 = vpop.f32.mrf.mxu0  ;;  %v2193_v33 = vpop.f32.mrf.mxu1 }
 0x1c9   : > { %v4799_v38 = vpop.f32.mrf.mxu0  ;;  %v4801_v53 = vpop.f32.mrf.mxu1 }
 0x1cb   : > { %v1971_v10 = vpop.f32.mrf.mxu0  ;;  %v2196_v42 = vpop.f32.mrf.mxu1 }
 0x1cd   : > { %v2199_v9 = vpop.f32.mrf.mxu1  ;;  %v3652_v18 = vpop.f32.mrf.mxu0 }
 0x1ce   : > { %v4804_v63 = vadd.f32 %v2199_v9, %v4725_v56  ;;  %v2369_v54 = vadd.f32 %v3652_v18, %v4624_v31  ;;  %v297_v18 = vld [vmem:[#allocation2 + $0x8] sm:$0xff] }
 0x1cf   : > { %v2201_v12 = vpop.f32.mrf.mxu1  ;;  %v2360_v30 = vpop.f32.mrf.mxu0 }
 0x1d0   : > { %v2617_v15 = vadd.f32 %v2369_v54, %v298_v50  ;;  %v2361_v11 = vadd.f32 %v2360_v30, %v4608_v5  ;;  %v302_v54 = vld [vmem:[#allocation2 + $0x30] sm:$0xff] }
 0x1d1   : > { %v2202_v33 = vpop.f32.mrf.mxu1  ;;  %v3653_v37 = vpop.f32.mrf.mxu0 }
 0x1d2   : > { %2682 = vst.msk [vmem:[#allocation2 + $0x10] sm:$0xff] %vm231_vm2, %v2617_v15  ;;  %v2615_v10 = vadd.f32 %v2361_v11, %v296_v17  ;;  %v4810_v42 = vadd.f32 %v2202_v33, %v4730_v45  ;;  %v2372_v56 = vadd.f32 %v3653_v37, %v4632_v43  ;;  %v300_v43 = vld [vmem:[#allocation2 + $0x20] sm:$0xff] }
 0x1d3   : > { %v2204_v9 = vpop.f32.mrf.mxu1  ;;  %v2363_v31 = vpop.f32.mrf.mxu0 }
 0x1d4   : > { %2680 = vst.msk [vmem:[#allocation2] sm:$0xff] %vm231_vm2, %v2615_v10  ;;  %v2618_v50 = vadd.f32 %v2372_v56, %v299_v26  ;;  %v2364_v30 = vadd.f32 %v2363_v31, %v4616_v19  ;;  %v303_v10 = vld [vmem:[#allocation2 + $0x38] sm:$0xff] }
 0x1d5   : > { %v4815_v5 = vpop.f32.mrf.mxu1  ;;  %v3656_v12 = vpop.f32.mrf.mxu0 }
 0x1d6   : > { %2683 = vst.msk [vmem:[#allocation2 + $0x18] sm:$0xff] %vm231_vm2, %v2618_v50  ;;  %v2616_v15 = vadd.f32 %v2364_v30, %v297_v18  ;;  %v2385_v45 = vadd.f32 %v3656_v12, %v4656_v21  ;;  %v301_v50 = vld [vmem:[#allocation2 + $0x28] sm:$0xff] }
 0x1d7   : > { %v2209_v17 = vpop.f32.mrf.mxu1  ;;  %v2376_v37 = vpop.f32.mrf.mxu0 }
 0x1d8   : > { %2681 = vst.msk [vmem:[#allocation2 + $0x8] sm:$0xff] %vm231_vm2, %v2616_v15  ;;  %v2621_v11 = vadd.f32 %v2385_v45, %v302_v54  ;;  %v2377_v26 = vadd.f32 %v2376_v37, %v4640_v57  ;;  %v306_v37 = vld [vmem:[#allocation2 + $0x50] sm:$0xff] }
 0x1d9   : > { %v2749_v19 = vld [vmem:[#allocation2 + $0x10] sm:$0xff]  ;;  %v4827_v33 = vpop.f32.mrf.mxu1  ;;  %v3657_v21 = vpop.f32.mrf.mxu0 }
 0x1da   : > { %v3541_v56 = vpack.c.bf16 %v2749_v19, %v2749_v19  ;;  %2686 = vst.msk [vmem:[#allocation2 + $0x30] sm:$0xff] %vm231_vm2, %v2621_v11  ;;  %v2619_v9 = vadd.f32 %v2377_v26, %v300_v43  ;;  %v2388_v18 = vadd.f32 %v3657_v21, %v4664_v36 }
 0x1db   : > { %v2747_v57 = vld [vmem:[#allocation2] sm:$0xff]  ;;  %v2212_v31 = vpop.f32.mrf.mxu1  ;;  %v2379_v30 = vpop.f32.mrf.mxu0 }
 0x1dc   : > { %3070 = vst.msk [vmem:[%s4825_s24 + $0x8] sm:$0xf] %vm3067_vm3, %v3541_v56  ;;  %v3539_v54 = vpack.c.bf16 %v2747_v57, %v2747_v57  ;;  %v2622_v12 = vadd.f32 %v2388_v18, %v303_v10  ;;  %v2380_v15 = vadd.f32 %v2379_v30, %v4648_v6  ;;  %v304_v56 = vld [vmem:[#allocation2 + $0x40] sm:$0xff]  ;;  %v307_v30 = vld [vmem:[#allocation2 + $0x58] sm:$0xff] }
 0x1dd   : > { %2684 = vst.msk [vmem:[#allocation2 + $0x20] sm:$0xff] %vm231_vm2, %v2619_v9  ;;  %v2750_v45 = vld [vmem:[#allocation2 + $0x18] sm:$0xff]  ;;  %v4835_v17 = vpop.f32.mrf.mxu1  ;;  %v3660_v43 = vpop.f32.mrf.mxu0 }
 0x1de   : > { %3068 = vst.msk [vmem:[%s4825_s24] sm:$0xf] %vm3067_vm3, %v3539_v54  ;;  %v3542_v36 = vpack.c.bf16 %v2750_v45, %v2750_v45  ;;  %v2620_v11 = vadd.f32 %v2380_v15, %v301_v50  ;;  %v2401_v26 = vadd.f32 %v3660_v43, %v4688_v41  ;;  %v305_v43 = vld [vmem:[#allocation2 + $0x48] sm:$0xff] }
 0x1df   : > { %2687 = vst.msk [vmem:[#allocation2 + $0x38] sm:$0xff] %vm231_vm2, %v2622_v12  ;;  %v2748_v19 = vld [vmem:[#allocation2 + $0x8] sm:$0xff]  ;;  %v2217_v21 = vpop.f32.mrf.mxu1  ;;  %v2392_v10 = vpop.f32.mrf.mxu0 }
 0x1e0   : > { %3071 = vst.msk [vmem:[%s4825_s24 + $0xc] sm:$0xf] %vm3067_vm3, %v3542_v36  ;;  %v3540_v6 = vpack.c.bf16 %v2748_v19, %v2748_v19  ;;  %v2625_v9 = vadd.f32 %v2401_v26, %v306_v37  ;;  %v2393_v18 = vadd.f32 %v2392_v10, %v4672_v25  ;;  %v310_v21 = vld [vmem:[#allocation2 + $0x70] sm:$0xff] }
 0x1e1   : > { %2685 = vst.msk [vmem:[#allocation2 + $0x28] sm:$0xff] %vm231_vm2, %v2620_v11  ;;  %v2753_v57 = vld [vmem:[#allocation2 + $0x30] sm:$0xff]  ;;  %v4845_v31 = vpop.f32.mrf.mxu1  ;;  %v3661_v50 = vpop.f32.mrf.mxu0 }
 0x1e2   : > { %3069 = vst.msk [vmem:[%s4825_s24 + $0x4] sm:$0xf] %vm3067_vm3, %v3540_v6  ;;  %v3545_v41 = vpack.c.bf16 %v2753_v57, %v2753_v57  ;;  %v2623_v54 = vadd.f32 %v2393_v18, %v304_v56  ;;  %v2404_v12 = vadd.f32 %v3661_v50, %v4696_v40  ;;  %v308_v57 = vld [vmem:[#allocation2 + $0x60] sm:$0xff] }
 0x1e3   : > { %2690 = vst.msk [vmem:[#allocation2 + $0x50] sm:$0xff] %vm231_vm2, %v2625_v9  ;;  %v2220_v45 = vpop.f32.mrf.mxu1  ;;  %v2395_v37 = vpop.f32.mrf.mxu0 }
 0x1e4   : > { %v2751_v15 = vld [vmem:[#allocation2 + $0x20] sm:$0xff]  ;;  %3074 = vst.msk [vmem:[%s4825_s24 + $0x18] sm:$0xf] %vm3067_vm3, %v3545_v41  ;;  %v2626_v36 = vadd.f32 %v2404_v12, %v307_v30  ;;  %v2396_v11 = vadd.f32 %v2395_v37, %v4680_v4 }
 0x1e5   : > { %v3543_v25 = vpack.c.bf16 %v2751_v15, %v2751_v15  ;;  %2688 = vst.msk [vmem:[#allocation2 + $0x40] sm:$0xff] %vm231_vm2, %v2623_v54  ;;  %v4855_v19 = vpop.f32.mrf.mxu1  ;;  %v3664_v56 = vpop.f32.mrf.mxu0  ;;  %v311_v15 = vld [vmem:[#allocation2 + $0x78] sm:$0xff] }
 0x1e6   : > { %v2754_v26 = vld [vmem:[#allocation2 + $0x38] sm:$0xff]  ;;  %2691 = vst.msk [vmem:[#allocation2 + $0x58] sm:$0xff] %vm231_vm2, %v2626_v36  ;;  %v2624_v10 = vadd.f32 %v2396_v11, %v305_v43  ;;  %v2417_v6 = vadd.f32 %v3664_v56, %v4718_v27  ;;  %v309_v11 = vld [vmem:[#allocation2 + $0x68] sm:$0xff] }
 0x1e7   : > { %3072 = vst.msk [vmem:[%s4825_s24 + $0x10] sm:$0xf] %vm3067_vm3, %v3543_v25  ;;  %v3546_v40 = vpack.c.bf16 %v2754_v26, %v2754_v26  ;;  %v2225_v18 = vpop.f32.mrf.mxu1  ;;  %v2408_v30 = vpop.f32.mrf.mxu0 }
 0x1e8   : > { %v2752_v9 = vld [vmem:[#allocation2 + $0x28] sm:$0xff]  ;;  %2689 = vst.msk [vmem:[#allocation2 + $0x48] sm:$0xff] %vm231_vm2, %v2624_v10  ;;  %v2629_v50 = vadd.f32 %v2417_v6, %v310_v21  ;;  %v2409_v41 = vadd.f32 %v2408_v30, %v4704_v58  ;;  %v314_v6 = vld [vmem:[#allocation2 + $0x90] sm:$0xff] }
 0x1e9   : > { %3075 = vst.msk [vmem:[%s4825_s24 + $0x1c] sm:$0xf] %vm3067_vm3, %v3546_v40  ;;  %v3544_v4 = vpack.c.bf16 %v2752_v9, %v2752_v9  ;;  %v4865_v12 = vpop.f32.mrf.mxu1  ;;  %v3665_v45 = vpop.f32.mrf.mxu0 }
 0x1ea   : > { %v2757_v54 = vld [vmem:[#allocation2 + $0x50] sm:$0xff]  ;;  %2694 = vst.msk [vmem:[#allocation2 + $0x70] sm:$0xff] %vm231_vm2, %v2629_v50  ;;  %v2627_v43 = vadd.f32 %v2409_v41, %v308_v57  ;;  %v2420_v37 = vadd.f32 %v3665_v45, %v4723_v48  ;;  %v312_v50 = vld [vmem:[#allocation2 + $0x80] sm:$0xff] }
 0x1eb   : > { %3073 = vst.msk [vmem:[%s4825_s24 + $0x14] sm:$0xf] %vm3067_vm3, %v3544_v4  ;;  %v3549_v27 = vpack.c.bf16 %v2757_v54, %v2757_v54  ;;  %v2228_v36 = vpop.f32.mrf.mxu1  ;;  %v2411_v26 = vpop.f32.mrf.mxu0 }
 0x1ec   : > { %v2755_v25 = vld [vmem:[#allocation2 + $0x40] sm:$0xff]  ;;  %2692 = vst.msk [vmem:[#allocation2 + $0x60] sm:$0xff] %vm231_vm2, %v2627_v43  ;;  %v2630_v21 = vadd.f32 %v2420_v37, %v311_v15  ;;  %v2412_v56 = vadd.f32 %v2411_v26, %v4712_v61  ;;  %v315_v43 = vld [vmem:[#allocation2 + $0x98] sm:$0xff] }
 0x1ed   : > { %3078 = vst.msk [vmem:[%s4825_s24 + $0x28] sm:$0xf] %vm3067_vm3, %v3549_v27  ;;  %v3547_v58 = vpack.c.bf16 %v2755_v25, %v2755_v25  ;;  %v2758_v40 = vld [vmem:[#allocation2 + $0x58] sm:$0xff]  ;;  %v4875_v10 = vpop.f32.mrf.mxu1  ;;  %v3668_v9 = vpop.f32.mrf.mxu0 }
 0x1ee   : > { %v3550_v48 = vpack.c.bf16 %v2758_v40, %v2758_v40  ;;  %2695 = vst.msk [vmem:[#allocation2 + $0x78] sm:$0xff] %vm231_vm2, %v2630_v21  ;;  %v2628_v18 = vadd.f32 %v2412_v56, %v309_v11  ;;  %v2433_v57 = vadd.f32 %v3668_v9, %v4738_v39 }
 0x1ef   : > { %3076 = vst.msk [vmem:[%s4825_s24 + $0x20] sm:$0xf] %vm3067_vm3, %v3547_v58  ;;  %v2756_v30 = vld [vmem:[#allocation2 + $0x48] sm:$0xff]  ;;  %v2233_v4 = vpop.f32.mrf.mxu1  ;;  %v2424_v41 = vpop.f32.mrf.mxu0 }
 0x1f0   : > { %3079 = vst.msk [vmem:[%s4825_s24 + $0x2c] sm:$0xf] %vm3067_vm3, %v3550_v48  ;;  %v3548_v61 = vpack.c.bf16 %v2756_v30, %v2756_v30  ;;  %v2633_v54 = vadd.f32 %v2433_v57, %v314_v6  ;;  %v2425_v15 = vadd.f32 %v2424_v41, %v4728_v60  ;;  %v313_v58 = vld [vmem:[#allocation2 + $0x88] sm:$0xff]  ;;  %v318_v48 = vld [vmem:[#allocation2 + $0xb0] sm:$0xff]  ;;  %v316_v41 = vld [vmem:[#allocation2 + $0xa0] sm:$0xff] }
 0x1f1   : > { %2693 = vst.msk [vmem:[#allocation2 + $0x68] sm:$0xff] %vm231_vm2, %v2628_v18  ;;  %v2761_v45 = vld [vmem:[#allocation2 + $0x70] sm:$0xff]  ;;  %v4885_v27 = vpop.f32.mrf.mxu1  ;;  %v3669_v37 = vpop.f32.mrf.mxu0 }
 0x1f2   : > { %3077 = vst.msk [vmem:[%s4825_s24 + $0x24] sm:$0xf] %vm3067_vm3, %v3548_v61  ;;  %v3553_v39 = vpack.c.bf16 %v2761_v45, %v2761_v45  ;;  %v2631_v25 = vadd.f32 %v2425_v15, %v312_v50  ;;  %v2436_v36 = vadd.f32 %v3669_v37, %v4743_v16  ;;  %v319_v37 = vld [vmem:[#allocation2 + $0xb8] sm:$0xff] }
 0x1f3   : > { %2698 = vst.msk [vmem:[#allocation2 + $0x90] sm:$0xff] %vm231_vm2, %v2633_v54  ;;  %v2759_v11 = vld [vmem:[#allocation2 + $0x60] sm:$0xff]  ;;  %v2236_v26 = vpop.f32.mrf.mxu1  ;;  %v2427_v21 = vpop.f32.mrf.mxu0 }
 0x1f4   : > { %3082 = vst.msk [vmem:[%s4825_s24 + $0x38] sm:$0xf] %vm3067_vm3, %v3553_v39  ;;  %v3551_v60 = vpack.c.bf16 %v2759_v11, %v2759_v11  ;;  %v2634_v56 = vadd.f32 %v2436_v36, %v315_v43  ;;  %v2428_v40 = vadd.f32 %v2427_v21, %v4733_v20 }
 0x1f5   : > { %2696 = vst.msk [vmem:[#allocation2 + $0x80] sm:$0xff] %vm231_vm2, %v2631_v25  ;;  %v2762_v6 = vld [vmem:[#allocation2 + $0x78] sm:$0xff]  ;;  %v4895_v9 = vpop.f32.mrf.mxu1  ;;  %v3672_v18 = vpop.f32.mrf.mxu0 }
 0x1f6   : > { %3080 = vst.msk [vmem:[%s4825_s24 + $0x30] sm:$0xf] %vm3067_vm3, %v3551_v60  ;;  %v3554_v16 = vpack.c.bf16 %v2762_v6, %v2762_v6  ;;  %v2632_v57 = vadd.f32 %v2428_v40, %v313_v58  ;;  %v2449_v30 = vadd.f32 %v3672_v18, %v4758_v7  ;;  %v317_v58 = vld [vmem:[#allocation2 + $0xa8] sm:$0xff] }
 0x1f7   : > { %2699 = vst.msk [vmem:[#allocation2 + $0x98] sm:$0xff] %vm231_vm2, %v2634_v56  ;;  %v2241_v50 = vpop.f32.mrf.mxu1  ;;  %v2440_v61 = vpop.f32.mrf.mxu0 }
 0x1f8   : > { %v2760_v4 = vld [vmem:[#allocation2 + $0x68] sm:$0xff]  ;;  %3083 = vst.msk [vmem:[%s4825_s24 + $0x3c] sm:$0xf] %vm3067_vm3, %v3554_v16  ;;  %v2637_v54 = vadd.f32 %v2449_v30, %v318_v48  ;;  %v2441_v15 = vadd.f32 %v2440_v61, %v4748_v2  ;;  %v322_v48 = vld [vmem:[#allocation2 + $0xd0] sm:$0xff]  ;;  %v320_v50 = vld [vmem:[#allocation2 + $0xc0] sm:$0xff] }
 0x1f9   : > { %v3552_v20 = vpack.c.bf16 %v2760_v4, %v2760_v4  ;;  %2697 = vst.msk [vmem:[#allocation2 + $0x88] sm:$0xff] %vm231_vm2, %v2632_v57  ;;  %v4905_v43 = vpop.f32.mrf.mxu1  ;;  %v3673_v39 = vpop.f32.mrf.mxu0 }
 0x1fa   : > { %v2765_v45 = vld [vmem:[#allocation2 + $0x90] sm:$0xff]  ;;  %2702 = vst.msk [vmem:[#allocation2 + $0xb0] sm:$0xff] %vm231_vm2, %v2637_v54  ;;  %v2635_v25 = vadd.f32 %v2441_v15, %v316_v41  ;;  %v2452_v36 = vadd.f32 %v3673_v39, %v4763_v55 }
 0x1fb   : > { %3081 = vst.msk [vmem:[%s4825_s24 + $0x34] sm:$0xf] %vm3067_vm3, %v3552_v20  ;;  %v3557_v7 = vpack.c.bf16 %v2765_v45, %v2765_v45  ;;  %v2244_v26 = vpop.f32.mrf.mxu1  ;;  %v2443_v21 = vpop.f32.mrf.mxu0  ;;  %v323_v45 = vld [vmem:[#allocation2 + $0xd8] sm:$0xff] }
 0x1fc   : > { %v2763_v11 = vld [vmem:[#allocation2 + $0x80] sm:$0xff]  ;;  %2700 = vst.msk [vmem:[#allocation2 + $0xa0] sm:$0xff] %vm231_vm2, %v2635_v25  ;;  %v2638_v60 = vadd.f32 %v2452_v36, %v319_v37  ;;  %v2444_v56 = vadd.f32 %v2443_v21, %v4753_v49 }
 0x1fd   : > { %3086 = vst.msk [vmem:[%s4825_s24 + $0x48] sm:$0xf] %vm3067_vm3, %v3557_v7  ;;  %v3555_v2 = vpack.c.bf16 %v2763_v11, %v2763_v11  ;;  %v4915_v6 = vpop.f32.mrf.mxu1  ;;  %v3676_v18 = vpop.f32.mrf.mxu0  ;;  %v321_v11 = vld [vmem:[#allocation2 + $0xc8] sm:$0xff] }
 0x1fe   : > { %v2766_v40 = vld [vmem:[#allocation2 + $0x98] sm:$0xff]  ;;  %2703 = vst.msk [vmem:[#allocation2 + $0xb8] sm:$0xff] %vm231_vm2, %v2638_v60  ;;  %v2636_v16 = vadd.f32 %v2444_v56, %v317_v58  ;;  %v2465_v57 = vadd.f32 %v3676_v18, %v4778_v28 }
 0x1ff   : > { %3084 = vst.msk [vmem:[%s4825_s24 + $0x40] sm:$0xf] %vm3067_vm3, %v3555_v2  ;;  %v3558_v55 = vpack.c.bf16 %v2766_v40, %v2766_v40  ;;  %v2249_v4 = vpop.f32.mrf.mxu1  ;;  %v2456_v41 = vpop.f32.mrf.mxu0 }
 0x200   : > { %v2764_v30 = vld [vmem:[#allocation2 + $0x88] sm:$0xff]  ;;  %2701 = vst.msk [vmem:[#allocation2 + $0xa8] sm:$0xff] %vm231_vm2, %v2636_v16  ;;  %v2641_v61 = vadd.f32 %v2465_v57, %v322_v48  ;;  %v2457_v20 = vadd.f32 %v2456_v41, %v4768_v34  ;;  %v2192_v34 = vadd.f32 %v4797_v32, %v4714_v22  ;;  %v324_v16 = vld [vmem:[#allocation2 + $0xe0] sm:$0xff] }
 0x201   : > { %3087 = vst.msk [vmem:[%s4825_s24 + $0x4c] sm:$0xf] %vm3067_vm3, %v3558_v55  ;;  %v3556_v49 = vpack.c.bf16 %v2764_v30, %v2764_v30  ;;  %v2769_v54 = vld [vmem:[#allocation2 + $0xb0] sm:$0xff]  ;;  %v4925_v15 = vpop.f32.mrf.mxu1  ;;  %v3677_v37 = vpop.f32.mrf.mxu0 }
 0x202   : > { %v3561_v28 = vpack.c.bf16 %v2769_v54, %v2769_v54  ;;  %2706 = vst.msk [vmem:[#allocation2 + $0xd0] sm:$0xff] %vm231_vm2, %v2641_v61  ;;  %v2639_v39 = vadd.f32 %v2457_v20, %v320_v50  ;;  %v2468_v7 = vadd.f32 %v3677_v37, %v4783_v3  ;;  %v326_v3 = vld [vmem:[#allocation2 + $0xf0] sm:$0xff]  ;;  %v327_v61 = vld [vmem:[#allocation2 + $0xf8] sm:$0xff] }
 0x203   : > { %3085 = vst.msk [vmem:[%s4825_s24 + $0x44] sm:$0xf] %vm3067_vm3, %v3556_v49  ;;  %v2767_v25 = vld [vmem:[#allocation2 + $0xa0] sm:$0xff]  ;;  %v2252_v36 = vpop.f32.mrf.mxu1  ;;  %v2459_v26 = vpop.f32.mrf.mxu0 }
 0x204   : > { %3090 = vst.msk [vmem:[%s4825_s24 + $0x58] sm:$0xf] %vm3067_vm3, %v3561_v28  ;;  %v3559_v58 = vpack.c.bf16 %v2767_v25, %v2767_v25  ;;  %v2642_v21 = vadd.f32 %v2468_v7, %v323_v45  ;;  %v2460_v2 = vadd.f32 %v2459_v26, %v4773_v46  ;;  %v2195_v46 = vadd.f32 %v4801_v53, %v4720_v44  ;;  %v325_v28 = vld [vmem:[#allocation2 + $0xe8] sm:$0xff] }
 0x205   : > { %2704 = vst.msk [vmem:[#allocation2 + $0xc0] sm:$0xff] %vm231_vm2, %v2639_v39  ;;  %v2770_v60 = vld [vmem:[#allocation2 + $0xb8] sm:$0xff]  ;;  %v4937_v56 = vpop.f32.mrf.mxu1  ;;  %v3680_v40 = vpop.f32.mrf.mxu0 }
 0x206   : > { %3088 = vst.msk [vmem:[%s4825_s24 + $0x50] sm:$0xf] %vm3067_vm3, %v3559_v58  ;;  %v3562_v48 = vpack.c.bf16 %v2770_v60, %v2770_v60  ;;  %v2640_v22 = vadd.f32 %v2460_v2, %v321_v11  ;;  %v2481_v32 = vadd.f32 %v3680_v40, %v2192_v34  ;;  %v330_v34 = vld [vmem:[#allocation2 + $0x110] sm:$0xff] }
 0x207   : > { %2707 = vst.msk [vmem:[#allocation2 + $0xd8] sm:$0xff] %vm231_vm2, %v2642_v21  ;;  %v2768_v18 = vld [vmem:[#allocation2 + $0xa8] sm:$0xff]  ;;  %v2257_v55 = vpop.f32.mrf.mxu1  ;;  %v2472_v57 = vpop.f32.mrf.mxu0 }
 0x208   : > { %3091 = vst.msk [vmem:[%s4825_s24 + $0x5c] sm:$0xf] %vm3067_vm3, %v3562_v48  ;;  %v3560_v30 = vpack.c.bf16 %v2768_v18, %v2768_v18  ;;  %v2645_v4 = vadd.f32 %v2481_v32, %v326_v3  ;;  %v2473_v50 = vadd.f32 %v2472_v57, %v4788_v1  ;;  %v2208_v1 = vadd.f32 %v4815_v5, %v4735_v52  ;;  %v328_v3 = vld [vmem:[#allocation2 + $0x100] sm:$0xff] }
 0x209   : > { %2705 = vst.msk [vmem:[#allocation2 + $0xc8] sm:$0xff] %vm231_vm2, %v2640_v22  ;;  %v2773_v41 = vld [vmem:[#allocation2 + $0xd0] sm:$0xff]  ;;  %v4948_v49 = vpop.f32.mrf.mxu1  ;;  %v3681_v20 = vpop.f32.mrf.mxu0 }
 0x20a   : > { %3089 = vst.msk [vmem:[%s4825_s24 + $0x54] sm:$0xf] %vm3067_vm3, %v3560_v30  ;;  %v3565_v54 = vpack.c.bf16 %v2773_v41, %v2773_v41  ;;  %v2643_v44 = vadd.f32 %v2473_v50, %v324_v16  ;;  %v2484_v53 = vadd.f32 %v3681_v20, %v2195_v46  ;;  %v331_v16 = vld [vmem:[#allocation2 + $0x118] sm:$0xff]  ;;  %v329_v50 = vld [vmem:[#allocation2 + $0x108] sm:$0xff] }
 0x20b   : > { %2710 = vst.msk [vmem:[#allocation2 + $0xf0] sm:$0xff] %vm231_vm2, %v2645_v4  ;;  %v2260_v37 = vpop.f32.mrf.mxu1  ;;  %v2475_v39 = vpop.f32.mrf.mxu0 }
 0x20c   : > { %v2771_v45 = vld [vmem:[#allocation2 + $0xc0] sm:$0xff]  ;;  %3094 = vst.msk [vmem:[%s4825_s24 + $0x68] sm:$0xf] %vm3067_vm3, %v3565_v54  ;;  %v2646_v25 = vadd.f32 %v2484_v53, %v327_v61  ;;  %v2476_v36 = vadd.f32 %v2475_v39, %v4793_v62  ;;  %v2211_v62 = vadd.f32 %v4827_v33, %v4740_v0 }
 0x20d   : > { %v3563_v7 = vpack.c.bf16 %v2771_v45, %v2771_v45  ;;  %2708 = vst.msk [vmem:[#allocation2 + $0xe0] sm:$0xff] %vm231_vm2, %v2643_v44  ;;  %v4959_v26 = vpop.f32.mrf.mxu1  ;;  %v3684_v58 = vpop.f32.mrf.mxu0  ;;  %v334_v45 = vld [vmem:[#allocation2 + $0x130] sm:$0xff] }
 0x20e   : > { %v2774_v11 = vld [vmem:[#allocation2 + $0xd8] sm:$0xff]  ;;  %2711 = vst.msk [vmem:[#allocation2 + $0xf8] sm:$0xff] %vm231_vm2, %v2646_v25  ;;  %v2644_v52 = vadd.f32 %v2476_v36, %v325_v28  ;;  %v2497_v5 = vadd.f32 %v3684_v58, %v2208_v1  ;;  %v2216_v28 = vadd.f32 %v4835_v17, %v4745_v8  ;;  %v2227_v36 = vadd.f32 %v4865_v12, %v4760_v51 }
 0x20f   : > { %3092 = vst.msk [vmem:[%s4825_s24 + $0x60] sm:$0xf] %vm3067_vm3, %v3563_v7  ;;  %v3566_v21 = vpack.c.bf16 %v2774_v11, %v2774_v11  ;;  %v2265_v60 = vpop.f32.mrf.mxu1  ;;  %v2488_v40 = vpop.f32.mrf.mxu0 }
 0x210   : > { %v2772_v2 = vld [vmem:[#allocation2 + $0xc8] sm:$0xff]  ;;  %2709 = vst.msk [vmem:[#allocation2 + $0xe8] sm:$0xff] %vm231_vm2, %v2644_v52  ;;  %v2649_v22 = vadd.f32 %v2497_v5, %v330_v34  ;;  %v2489_v32 = vadd.f32 %v2488_v40, %v4804_v63  ;;  %v2224_v63 = vadd.f32 %v4855_v19, %v4755_v35  ;;  %v2219_v5 = vadd.f32 %v4845_v31, %v4750_v23 }
 0x211   : > { %3095 = vst.msk [vmem:[%s4825_s24 + $0x6c] sm:$0xf] %vm3067_vm3, %v3566_v21  ;;  %v3564_v48 = vpack.c.bf16 %v2772_v2, %v2772_v2  ;;  %v4970_v55 = vpop.f32.mrf.mxu1  ;;  %v3685_v57 = vpop.f32.mrf.mxu0  ;;  %v335_v21 = vld [vmem:[#allocation2 + $0x138] sm:$0xff]  ;;  %v333_v40 = vld [vmem:[#allocation2 + $0x128] sm:$0xff] }
 0x212   : > { %v2777_v18 = vld [vmem:[#allocation2 + $0xf0] sm:$0xff]  ;;  %2714 = vst.msk [vmem:[#allocation2 + $0x110] sm:$0xff] %vm231_vm2, %v2649_v22  ;;  %v2647_v0 = vadd.f32 %v2489_v32, %v328_v3  ;;  %v2500_v33 = vadd.f32 %v3685_v57, %v2211_v62 }
 0x213   : > { %3093 = vst.msk [vmem:[%s4825_s24 + $0x64] sm:$0xf] %vm3067_vm3, %v3564_v48  ;;  %v3569_v46 = vpack.c.bf16 %v2777_v18, %v2777_v18  ;;  %v2268_v4 = vpop.f32.mrf.mxu1  ;;  %v2491_v41 = vpop.f32.mrf.mxu0  ;;  %v2240_v48 = vadd.f32 %v4895_v9, %v4775_v14 }
 0x214   : > { %v2775_v30 = vld [vmem:[#allocation2 + $0xe0] sm:$0xff]  ;;  %2712 = vst.msk [vmem:[#allocation2 + $0x100] sm:$0xff] %vm231_vm2, %v2647_v0  ;;  %v2650_v20 = vadd.f32 %v2500_v33, %v331_v16  ;;  %v2492_v54 = vadd.f32 %v2491_v41, %v4810_v42  ;;  %v338_v16 = vld [vmem:[#allocation2 + $0x150] sm:$0xff]  ;;  %v2243_v41 = vadd.f32 %v4905_v43, %v4780_v47 }
 0x215   : > { %3098 = vst.msk [vmem:[%s4825_s24 + $0x78] sm:$0xf] %vm3067_vm3, %v3569_v46  ;;  %v3567_v61 = vpack.c.bf16 %v2775_v30, %v2775_v30  ;;  %v2778_v44 = vld [vmem:[#allocation2 + $0xf8] sm:$0xff]  ;;  %v4981_v53 = vpop.f32.mrf.mxu1  ;;  %v3688_v37 = vpop.f32.mrf.mxu0  ;;  %v332_v42 = vld [vmem:[#allocation2 + $0x120] sm:$0xff]  ;;  %v2232_v46 = vadd.f32 %v4875_v10, %v4765_v59 }
 0x216   : > { %v3570_v35 = vpack.c.bf16 %v2778_v44, %v2778_v44  ;;  %2715 = vst.msk [vmem:[#allocation2 + $0x118] sm:$0xff] %vm231_vm2, %v2650_v20  ;;  %v2648_v19 = vadd.f32 %v2492_v54, %v329_v50  ;;  %v2513_v39 = vadd.f32 %v3688_v37, %v2224_v63  ;;  %v336_v4 = vld [vmem:[#allocation2 + $0x140] sm:$0xff]  ;;  %v339_v54 = vld [vmem:[#allocation2 + $0x158] sm:$0xff] }
 0x217   : > { %3096 = vst.msk [vmem:[%s4825_s24 + $0x70] sm:$0xf] %vm3067_vm3, %v3567_v61  ;;  %v2776_v1 = vld [vmem:[#allocation2 + $0xe8] sm:$0xff]  ;;  %v2273_v7 = vpop.f32.mrf.mxu1  ;;  %v2504_v25 = vpop.f32.mrf.mxu0 }
 0x218   : > { %3099 = vst.msk [vmem:[%s4825_s24 + $0x7c] sm:$0xf] %vm3067_vm3, %v3570_v35  ;;  %v3568_v11 = vpack.c.bf16 %v2776_v1, %v2776_v1  ;;  %v2653_v8 = vadd.f32 %v2513_v39, %v334_v45  ;;  %v2505_v17 = vadd.f32 %v2504_v25, %v2216_v28  ;;  %v2235_v45 = vadd.f32 %v4885_v27, %v4770_v13 }
 0x219   : > { %2713 = vst.msk [vmem:[#allocation2 + $0x108] sm:$0xff] %vm231_vm2, %v2648_v19  ;;  %v2781_v34 = vld [vmem:[#allocation2 + $0x110] sm:$0xff]  ;;  %v4993_v58 = vpop.f32.mrf.mxu1  ;;  %v3689_v52 = vpop.f32.mrf.mxu0  ;;  %v337_v19 = vld [vmem:[#allocation2 + $0x148] sm:$0xff]  ;;  %v2256_v1 = vadd.f32 %v4937_v56, %v4795_v24 }
 0x21a   : > { %3097 = vst.msk [vmem:[%s4825_s24 + $0x74] sm:$0xf] %vm3067_vm3, %v3568_v11  ;;  %v3573_v2 = vpack.c.bf16 %v2781_v34, %v2781_v34  ;;  %v2651_v51 = vadd.f32 %v2505_v17, %v332_v42  ;;  %v2516_v12 = vadd.f32 %v3689_v52, %v2227_v36  ;;  %v342_v36 = vld [vmem:[#allocation2 + $0x170] sm:$0xff]  ;;  %v340_v52 = vld [vmem:[#allocation2 + $0x160] sm:$0xff] }
 0x21b   : > { %2718 = vst.msk [vmem:[#allocation2 + $0x130] sm:$0xff] %vm231_vm2, %v2653_v8  ;;  %v2779_v60 = vld [vmem:[#allocation2 + $0x100] sm:$0xff]  ;;  %v2276_v3 = vpop.f32.mrf.mxu1  ;;  %v2507_v62 = vpop.f32.mrf.mxu0  ;;  %v2248_v8 = vadd.f32 %v4915_v6, %v4785_v29 }
 0x21c   : > { %3102 = vst.msk [vmem:[%s4825_s24 + $0x88] sm:$0xf] %vm3067_vm3, %v3573_v2  ;;  %v3571_v22 = vpack.c.bf16 %v2779_v60, %v2779_v60  ;;  %v2654_v23 = vadd.f32 %v2516_v12, %v335_v21  ;;  %v2508_v31 = vadd.f32 %v2507_v62, %v2219_v5  ;;  %v2259_v2 = vadd.f32 %v4948_v49, %v4799_v38  ;;  %v343_v3 = vld [vmem:[#allocation2 + $0x178] sm:$0xff]  ;;  %v5174_v62 = vld [vmem:[#allocation19_spill] sm:$0xff] }
 0x21d   : > { %2716 = vst.msk [vmem:[#allocation2 + $0x120] sm:$0xff] %vm231_vm2, %v2651_v51  ;;  %v2782_v32 = vld [vmem:[#allocation2 + $0x118] sm:$0xff]  ;;  %v5005_v18 = vpop.f32.mrf.mxu1  ;;  %v3692_v57 = vpop.f32.mrf.mxu0 }
 0x21e   : > { %3100 = vst.msk [vmem:[%s4825_s24 + $0x80] sm:$0xf] %vm3067_vm3, %v3571_v22  ;;  %v3574_v0 = vpack.c.bf16 %v2782_v32, %v2782_v32  ;;  %v2652_v14 = vadd.f32 %v2508_v31, %v333_v40  ;;  %v2529_v9 = vadd.f32 %v3692_v57, %v2240_v48  ;;  %v2251_v48 = vadd.f32 %v4925_v15, %v5174_v62  ;;  %v341_v32 = vld [vmem:[#allocation2 + $0x168] sm:$0xff]  ;;  %v5175_v57 = vld [vmem:[#allocation5_spill] sm:$0xff]  ;;  %v348_v62 = vld [vmem:[#allocation2 + $0x1a0] sm:$0xff] }
 0x21f   : > { %2719 = vst.msk [vmem:[#allocation2 + $0x138] sm:$0xff] %vm231_vm2, %v2654_v23  ;;  %v2281_v30 = vpop.f32.mrf.mxu1  ;;  %v2520_v50 = vpop.f32.mrf.mxu0 }
 0x220   : > { %v2780_v33 = vld [vmem:[#allocation2 + $0x108] sm:$0xff]  ;;  %3103 = vst.msk [vmem:[%s4825_s24 + $0x8c] sm:$0xf] %vm3067_vm3, %v3574_v0  ;;  %v2657_v59 = vadd.f32 %v2529_v9, %v338_v16  ;;  %v2521_v10 = vadd.f32 %v2520_v50, %v2232_v46  ;;  %v2272_v46 = vadd.f32 %v4981_v53, %v5175_v57  ;;  %v346_v30 = vld [vmem:[#allocation2 + $0x190] sm:$0xff]  ;;  %v5176_v50 = vld [vmem:[#allocation3_spill] sm:$0xff] }
 0x221   : > { %v3572_v63 = vpack.c.bf16 %v2780_v33, %v2780_v33  ;;  %2717 = vst.msk [vmem:[#allocation2 + $0x128] sm:$0xff] %vm231_vm2, %v2652_v14  ;;  %v5017_v20 = vpop.f32.mrf.mxu1  ;;  %v3693_v44 = vpop.f32.mrf.mxu0 }
 0x222   : > { %v2785_v61 = vld [vmem:[#allocation2 + $0x130] sm:$0xff]  ;;  %2722 = vst.msk [vmem:[#allocation2 + $0x150] sm:$0xff] %vm231_vm2, %v2657_v59  ;;  %v2655_v47 = vadd.f32 %v2521_v10, %v336_v4  ;;  %v2532_v43 = vadd.f32 %v3693_v44, %v2243_v41  ;;  %v2264_v41 = vadd.f32 %v4959_v26, %v5176_v50 }
 0x223   : > { %3101 = vst.msk [vmem:[%s4825_s24 + $0x84] sm:$0xf] %vm3067_vm3, %v3572_v63  ;;  %v3577_v37 = vpack.c.bf16 %v2785_v61, %v2785_v61  ;;  %v2284_v35 = vpop.f32.mrf.mxu1  ;;  %v2523_v39 = vpop.f32.mrf.mxu0 }
 0x224   : > { %v2783_v28 = vld [vmem:[#allocation2 + $0x120] sm:$0xff]  ;;  %2720 = vst.msk [vmem:[#allocation2 + $0x140] sm:$0xff] %vm231_vm2, %v2655_v47  ;;  %v2658_v13 = vadd.f32 %v2532_v43, %v339_v54  ;;  %v2524_v27 = vadd.f32 %v2523_v39, %v2235_v45  ;;  %v5177_v45 = vld [vmem:[#allocation6_spill] sm:$0xff] }
 0x225   : > { %3106 = vst.msk [vmem:[%s4825_s24 + $0x98] sm:$0xf] %vm3067_vm3, %v3577_v37  ;;  %v3575_v7 = vpack.c.bf16 %v2783_v28, %v2783_v28  ;;  %v5029_v25 = vpop.f32.mrf.mxu1  ;;  %v3696_v11 = vpop.f32.mrf.mxu0  ;;  %v344_v54 = vld [vmem:[#allocation2 + $0x180] sm:$0xff]  ;;  %v2275_v37 = vadd.f32 %v4993_v58, %v5177_v45 }
 0x226   : > { %v2786_v42 = vld [vmem:[#allocation2 + $0x138] sm:$0xff]  ;;  %2723 = vst.msk [vmem:[#allocation2 + $0x158] sm:$0xff] %vm231_vm2, %v2658_v13  ;;  %v2656_v24 = vadd.f32 %v2524_v27, %v337_v19  ;;  %v2545_v56 = vadd.f32 %v3696_v11, %v2256_v1  ;;  %v5178_v1 = vld [vmem:[#allocation4_spill] sm:$0xff]  ;;  %v5184_v45 = vld [vmem:[#allocation11_spill] sm:$0xff] }
 0x227   : > { %3104 = vst.msk [vmem:[%s4825_s24 + $0x90] sm:$0xf] %vm3067_vm3, %v3575_v7  ;;  %v3578_v17 = vpack.c.bf16 %v2786_v42, %v2786_v42  ;;  %v2289_v21 = vpop.f32.mrf.mxu1  ;;  %v2536_v5 = vpop.f32.mrf.mxu0  ;;  %v347_v19 = vld [vmem:[#allocation2 + $0x198] sm:$0xff]  ;;  %v2267_v7 = vadd.f32 %v4970_v55, %v5178_v1  ;;  %v345_v11 = vld [vmem:[#allocation2 + $0x188] sm:$0xff] }
 0x228   : > { %v2784_v34 = vld [vmem:[#allocation2 + $0x128] sm:$0xff]  ;;  %2721 = vst.msk [vmem:[#allocation2 + $0x148] sm:$0xff] %vm231_vm2, %v2656_v24  ;;  %v2661_v29 = vadd.f32 %v2545_v56, %v342_v36  ;;  %v2537_v6 = vadd.f32 %v2536_v5, %v2248_v8  ;;  %v350_v5 = vld [vmem:[#allocation2 + $0x1b0] sm:$0xff] }
 0x229   : > { %3107 = vst.msk [vmem:[%s4825_s24 + $0x9c] sm:$0xf] %vm3067_vm3, %v3578_v17  ;;  %v3576_v51 = vpack.c.bf16 %v2784_v34, %v2784_v34  ;;  %v2789_v12 = vld [vmem:[#allocation2 + $0x150] sm:$0xff]  ;;  %v5041_v60 = vpop.f32.mrf.mxu1  ;;  %v3697_v40 = vpop.f32.mrf.mxu0 }
 0x22a   : > { %v3581_v22 = vpack.c.bf16 %v2789_v12, %v2789_v12  ;;  %2726 = vst.msk [vmem:[#allocation2 + $0x170] sm:$0xff] %vm231_vm2, %v2661_v29  ;;  %v2659_v38 = vadd.f32 %v2537_v6, %v340_v52  ;;  %v2548_v49 = vadd.f32 %v3697_v40, %v2259_v2  ;;  %v5179_v17 = vld [vmem:[#allocation9_spill] sm:$0xff] }
 0x22b   : > { %3105 = vst.msk [vmem:[%s4825_s24 + $0x94] sm:$0xf] %vm3067_vm3, %v3576_v51  ;;  %v2787_v23 = vld [vmem:[#allocation2 + $0x140] sm:$0xff]  ;;  %v2292_v31 = vpop.f32.mrf.mxu1  ;;  %v2539_v16 = vpop.f32.mrf.mxu0  ;;  %v2288_v24 = vadd.f32 %v5029_v25, %v5179_v17  ;;  %v5186_v17 = vld [vmem:[#allocation12_spill] sm:$0xff] }
 0x22c   : > { %3110 = vst.msk [vmem:[%s4825_s24 + $0xa8] sm:$0xf] %vm3067_vm3, %v3581_v22  ;;  %v3579_v0 = vpack.c.bf16 %v2787_v23, %v2787_v23  ;;  %v2662_v15 = vadd.f32 %v2548_v49, %v343_v3  ;;  %v2540_v14 = vadd.f32 %v2539_v16, %v2251_v48  ;;  %v5180_v51 = vld [vmem:[#allocation7_spill] sm:$0xff]  ;;  %v5181_v22 = vld [vmem:[#allocation10_spill] sm:$0xff] }
 0x22d   : > { %2724 = vst.msk [vmem:[#allocation2 + $0x160] sm:$0xff] %vm231_vm2, %v2659_v38  ;;  %v2790_v9 = vld [vmem:[#allocation2 + $0x158] sm:$0xff]  ;;  %v5053_v33 = vpop.f32.mrf.mxu1  ;;  %v3700_v4 = vpop.f32.mrf.mxu0  ;;  %v2280_v29 = vadd.f32 %v5005_v18, %v5180_v51  ;;  %v2291_v38 = vadd.f32 %v5041_v60, %v5181_v22  ;;  %v5188_v22 = vld [vmem:[#allocation17_spill] sm:$0xff] }
 0x22e   : > { %3108 = vst.msk [vmem:[%s4825_s24 + $0xa0] sm:$0xf] %vm3067_vm3, %v3579_v0  ;;  %v3582_v63 = vpack.c.bf16 %v2790_v9, %v2790_v9  ;;  %v2660_v53 = vadd.f32 %v2540_v14, %v341_v32  ;;  %v2561_v59 = vadd.f32 %v3700_v4, %v2272_v46  ;;  %v351_v16 = vld [vmem:[#allocation2 + $0x1b8] sm:$0xff]  ;;  %v5182_v46 = vld [vmem:[#allocation8_spill] sm:$0xff] }
 0x22f   : > { %2727 = vst.msk [vmem:[#allocation2 + $0x178] sm:$0xff] %vm231_vm2, %v2662_v15  ;;  %v2788_v10 = vld [vmem:[#allocation2 + $0x148] sm:$0xff]  ;;  %v2297_v61 = vpop.f32.mrf.mxu1  ;;  %v2552_v44 = vpop.f32.mrf.mxu0  ;;  %v2283_v0 = vadd.f32 %v5017_v20, %v5182_v46 }
 0x230   : > { %3111 = vst.msk [vmem:[%s4825_s24 + $0xac] sm:$0xf] %vm3067_vm3, %v3582_v63  ;;  %v3580_v47 = vpack.c.bf16 %v2788_v10, %v2788_v10  ;;  %v2665_v26 = vadd.f32 %v2561_v59, %v346_v30  ;;  %v2553_v43 = vadd.f32 %v2552_v44, %v2264_v41  ;;  %v349_v4 = vld [vmem:[#allocation2 + $0x1a8] sm:$0xff]  ;;  %v5183_v63 = vld [vmem:[#allocation13_spill] sm:$0xff] }
 0x231   : > { %2725 = vst.msk [vmem:[#allocation2 + $0x168] sm:$0xff] %vm231_vm2, %v2660_v53  ;;  %v2793_v28 = vld [vmem:[#allocation2 + $0x170] sm:$0xff]  ;;  %v5065_v35 = vpop.f32.mrf.mxu1  ;;  %v3701_v39 = vpop.f32.mrf.mxu0 }
 0x232   : > { %3109 = vst.msk [vmem:[%s4825_s24 + $0xa4] sm:$0xf] %vm3067_vm3, %v3580_v47  ;;  %v3585_v13 = vpack.c.bf16 %v2793_v28, %v2793_v28  ;;  %v2663_v58 = vadd.f32 %v2553_v43, %v344_v54  ;;  %v2564_v27 = vadd.f32 %v3701_v39, %v2275_v37  ;;  %v354_v54 = vld [vmem:[#allocation2 + $0x1d0] sm:$0xff]  ;;  %v2296_v37 = vadd.f32 %v5053_v33, %v5184_v45  ;;  %v352_v39 = vld [vmem:[#allocation2 + $0x1c0] sm:$0xff] }
 0x233   : > { %2730 = vst.msk [vmem:[#allocation2 + $0x190] sm:$0xff] %vm231_vm2, %v2665_v26  ;;  %v2300_v36 = vpop.f32.mrf.mxu1  ;;  %v2555_v8 = vpop.f32.mrf.mxu0 }
 0x234   : > { %v2791_v42 = vld [vmem:[#allocation2 + $0x160] sm:$0xff]  ;;  %3114 = vst.msk [vmem:[%s4825_s24 + $0xb8] sm:$0xf] %vm3067_vm3, %v3585_v13  ;;  %v2666_v55 = vadd.f32 %v2564_v27, %v347_v19  ;;  %v2556_v34 = vadd.f32 %v2555_v8, %v2267_v7  ;;  %v5185_v13 = vld [vmem:[#allocation14_spill] sm:$0xff] }
 0x235   : > { %v3583_v56 = vpack.c.bf16 %v2791_v42, %v2791_v42  ;;  %2728 = vst.msk [vmem:[#allocation2 + $0x180] sm:$0xff] %vm231_vm2, %v2663_v58  ;;  %v2303_v52 = vpop.f32.mrf.mxu1  ;;  %v3704_v2 = vpop.f32.mrf.mxu0 }
 0x236   : > { %v2794_v21 = vld [vmem:[#allocation2 + $0x178] sm:$0xff]  ;;  %2731 = vst.msk [vmem:[#allocation2 + $0x198] sm:$0xff] %vm231_vm2, %v2666_v55  ;;  %v2664_v25 = vadd.f32 %v2556_v34, %v345_v11  ;;  %v2577_v12 = vadd.f32 %v3704_v2, %v2288_v24  ;;  %v2304_v53 = vadd.f32 %v2303_v52, %v5183_v63  ;;  %v2299_v24 = vadd.f32 %v5065_v35, %v5186_v17 }
 0x237   : > { %3112 = vst.msk [vmem:[%s4825_s24 + $0xb0] sm:$0xf] %vm3067_vm3, %v3583_v56  ;;  %v3586_v6 = vpack.c.bf16 %v2794_v21, %v2794_v21  ;;  %v2305_v40 = vpop.f32.mrf.mxu1  ;;  %v2568_v48 = vpop.f32.mrf.mxu0  ;;  %v355_v11 = vld [vmem:[#allocation2 + $0x1d8] sm:$0xff] }
 0x238   : > { %v2792_v3 = vld [vmem:[#allocation2 + $0x168] sm:$0xff]  ;;  %2729 = vst.msk [vmem:[#allocation2 + $0x188] sm:$0xff] %vm231_vm2, %v2664_v25  ;;  %v2669_v18 = vadd.f32 %v2577_v12, %v350_v5  ;;  %v2569_v23 = vadd.f32 %v2568_v48, %v2280_v29  ;;  %v5187_v40 = vld [vmem:[#allocation15_spill] sm:$0xff] }
 0x239   : > { %3115 = vst.msk [vmem:[%s4825_s24 + $0xbc] sm:$0xf] %vm3067_vm3, %v3586_v6  ;;  %v3584_v49 = vpack.c.bf16 %v2792_v3, %v2792_v3  ;;  %v2306_v32 = vpop.f32.mrf.mxu1  ;;  %v3705_v57 = vpop.f32.mrf.mxu0  ;;  %v353_v5 = vld [vmem:[#allocation2 + $0x1c8] sm:$0xff] }
 0x23a   : > { %v2797_v31 = vld [vmem:[#allocation2 + $0x190] sm:$0xff]  ;;  %2734 = vst.msk [vmem:[#allocation2 + $0x1b0] sm:$0xff] %vm231_vm2, %v2669_v18  ;;  %v2667_v60 = vadd.f32 %v2569_v23, %v348_v62  ;;  %v2580_v14 = vadd.f32 %v3705_v57, %v2291_v38  ;;  %v2307_v58 = vadd.f32 %v2306_v32, %v5185_v13 }
 0x23b   : > { %3113 = vst.msk [vmem:[%s4825_s24 + $0xb4] sm:$0xf] %vm3067_vm3, %v3584_v49  ;;  %v3589_v15 = vpack.c.bf16 %v2797_v31, %v2797_v31  ;;  %v2308_v30 = vpop.f32.mrf.mxu1  ;;  %v2571_v50 = vpop.f32.mrf.mxu0  ;;  %v358_v18 = vld [vmem:[#allocation2 + $0x1f0] sm:$0xff]  ;;  %v356_v31 = vld [vmem:[#allocation2 + $0x1e0] sm:$0xff] }
 0x23c   : > { %v2795_v9 = vld [vmem:[#allocation2 + $0x180] sm:$0xff]  ;;  %2732 = vst.msk [vmem:[#allocation2 + $0x1a0] sm:$0xff] %vm231_vm2, %v2667_v60  ;;  %v2670_v20 = vadd.f32 %v2580_v14, %v351_v16  ;;  %v2572_v59 = vadd.f32 %v2571_v50, %v2283_v0 }
 0x23d   : > { %3118 = vst.msk [vmem:[%s4825_s24 + $0xc8] sm:$0xf] %vm3067_vm3, %v3589_v15  ;;  %v3587_v41 = vpack.c.bf16 %v2795_v9, %v2795_v9  ;;  %v2798_v10 = vld [vmem:[#allocation2 + $0x198] sm:$0xff]  ;;  %v2311_v61 = vpop.f32.mrf.mxu1  ;;  %v3708_v44 = vpop.f32.mrf.mxu0  ;;  %v5189_v15 = vld [vmem:[#allocation16_spill] sm:$0xff] }
 0x23e   : > { %v3590_v47 = vpack.c.bf16 %v2798_v10, %v2798_v10  ;;  %2735 = vst.msk [vmem:[#allocation2 + $0x1b8] sm:$0xff] %vm231_vm2, %v2670_v20  ;;  %v2668_v26 = vadd.f32 %v2572_v59, %v349_v4  ;;  %v2593_v43 = vadd.f32 %v3708_v44, %v2304_v53  ;;  %v2312_v62 = vadd.f32 %v2311_v61, %v5187_v40  ;;  %v359_v20 = vld [vmem:[#allocation2 + $0x1f8] sm:$0xff]  ;;  %v357_v10 = vld [vmem:[#allocation2 + $0x1e8] sm:$0xff] }
 0x23f   : > { %3116 = vst.msk [vmem:[%s4825_s24 + $0xc0] sm:$0xf] %vm3067_vm3, %v3587_v41  ;;  %v2796_v28 = vld [vmem:[#allocation2 + $0x188] sm:$0xff]  ;;  %v2313_v19 = vpop.f32.mrf.mxu1  ;;  %v2584_v1 = vpop.f32.mrf.mxu0  ;;  %v5190_v41 = vld [vmem:[#allocation18_spill] sm:$0xff] }
 0x240   : > { %3119 = vst.msk [vmem:[%s4825_s24 + $0xcc] sm:$0xf] %vm3067_vm3, %v3590_v47  ;;  %v3588_v7 = vpack.c.bf16 %v2796_v28, %v2796_v28  ;;  %v2673_v33 = vadd.f32 %v2593_v43, %v354_v54  ;;  %v2585_v27 = vadd.f32 %v2584_v1, %v2296_v37 }
 0x241   : > { %2733 = vst.msk [vmem:[#allocation2 + $0x1a8] sm:$0xff] %vm231_vm2, %v2668_v26  ;;  %v2801_v42 = vld [vmem:[#allocation2 + $0x1b0] sm:$0xff]  ;;  %v2314_v36 = vpop.f32.mrf.mxu1  ;;  %v3709_v8 = vpop.f32.mrf.mxu0 }
 0x242   : > { %3117 = vst.msk [vmem:[%s4825_s24 + $0xc4] sm:$0xf] %vm3067_vm3, %v3588_v7  ;;  %v3593_v56 = vpack.c.bf16 %v2801_v42, %v2801_v42  ;;  %v2671_v55 = vadd.f32 %v2585_v27, %v352_v39  ;;  %v2596_v34 = vadd.f32 %v3709_v8, %v2307_v58  ;;  %v2315_v60 = vadd.f32 %v2314_v36, %v5189_v15 }
 0x243   : > { %2738 = vst.msk [vmem:[#allocation2 + $0x1d0] sm:$0xff] %vm231_vm2, %v2673_v33  ;;  %v2799_v21 = vld [vmem:[#allocation2 + $0x1a0] sm:$0xff]  ;;  %v2316_v52 = vpop.f32.mrf.mxu1  ;;  %v2587_v2 = vpop.f32.mrf.mxu0 }
 0x244   : > { %3122 = vst.msk [vmem:[%s4825_s24 + $0xd8] sm:$0xf] %vm3067_vm3, %v3593_v56  ;;  %v3591_v51 = vpack.c.bf16 %v2799_v21, %v2799_v21  ;;  %v2674_v29 = vadd.f32 %v2596_v34, %v355_v11  ;;  %v2588_v35 = vadd.f32 %v2587_v2, %v2299_v24 }
 0x245   : > { %2736 = vst.msk [vmem:[#allocation2 + $0x1c0] sm:$0xff] %vm231_vm2, %v2671_v55  ;;  %v2802_v6 = vld [vmem:[#allocation2 + $0x1b8] sm:$0xff]  ;;  %v2319_v25 = vpop.f32.mrf.mxu1  ;;  %v3712_v12 = vpop.f32.mrf.mxu0 }
 0x246   : > { %3120 = vst.msk [vmem:[%s4825_s24 + $0xd0] sm:$0xf] %vm3067_vm3, %v3591_v51  ;;  %v3594_v3 = vpack.c.bf16 %v2802_v6, %v2802_v6  ;;  %v2672_v48 = vadd.f32 %v2588_v35, %v353_v5  ;;  %v2320_v38 = vadd.f32 %v2319_v25, %v5188_v22 }
 0x247   : > { %2739 = vst.msk [vmem:[#allocation2 + $0x1d8] sm:$0xff] %vm231_vm2, %v2674_v29  ;;  %v2321_v23 = vpop.f32.mrf.mxu1  ;;  %v2600_v32 = vpop.f32.mrf.mxu0 }
 0x248   : > { %v2800_v49 = vld [vmem:[#allocation2 + $0x1a8] sm:$0xff]  ;;  %3123 = vst.msk [vmem:[%s4825_s24 + $0xdc] sm:$0xf] %vm3067_vm3, %v3594_v3  ;;  %v2609_v57 = vadd.f32 %v3712_v12, %v2320_v38  ;;  %v2601_v46 = vadd.f32 %v2600_v32, %v2312_v62 }
 0x249   : > { %v3592_v16 = vpack.c.bf16 %v2800_v49, %v2800_v49  ;;  %2737 = vst.msk [vmem:[#allocation2 + $0x1c8] sm:$0xff] %vm231_vm2, %v2672_v48  ;;  %v2322_v14 = vpop.f32.mrf.mxu1  ;;  %v3713_v9 = vpop.f32.mrf.mxu0 }
 0x24a   : > { %v2805_v0 = vld [vmem:[#allocation2 + $0x1d0] sm:$0xff]  ;;  %v2677_v4 = vadd.f32 %v2609_v57, %v358_v18  ;;  %v2675_v50 = vadd.f32 %v2601_v46, %v356_v31  ;;  %v2323_v63 = vadd.f32 %v2322_v14, %v5190_v41 }
 0x24b   : > { %3121 = vst.msk [vmem:[%s4825_s24 + $0xd4] sm:$0xf] %vm3067_vm3, %v3592_v16  ;;  %v3597_v30 = vpack.c.bf16 %v2805_v0, %v2805_v0  ;;  %v2324_v59 = vpop.f32.mrf.mxu1  ;;  %v2603_v61 = vpop.f32.mrf.mxu0 }
 0x24c   : > { %v2803_v53 = vld [vmem:[#allocation2 + $0x1c0] sm:$0xff]  ;;  %2742 = vst.msk [vmem:[#allocation2 + $0x1f0] sm:$0xff] %vm231_vm2, %v2677_v4  ;;  %2740 = vst.msk [vmem:[#allocation2 + $0x1e0] sm:$0xff] %vm231_vm2, %v2675_v50  ;;  %v2612_v44 = vadd.f32 %v3713_v9, %v2323_v63  ;;  %v2604_v45 = vadd.f32 %v2603_v61, %v2315_v60 }
 0x24d   : > { %3126 = vst.msk [vmem:[%s4825_s24 + $0xe8] sm:$0xf] %vm3067_vm3, %v3597_v30  ;;  %v3595_v54 = vpack.c.bf16 %v2803_v53, %v2803_v53 }
 0x24e   : > { %v2806_v37 = vld [vmem:[#allocation2 + $0x1d8] sm:$0xff]  ;;  %v2678_v26 = vadd.f32 %v2612_v44, %v359_v20  ;;  %v2676_v43 = vadd.f32 %v2604_v45, %v357_v10 }
 0x24f   : > { %3124 = vst.msk [vmem:[%s4825_s24 + $0xe0] sm:$0xf] %vm3067_vm3, %v3595_v54  ;;  %v3598_v47 = vpack.c.bf16 %v2806_v37, %v2806_v37 }
 0x250   : > { %v2804_v28 = vld [vmem:[#allocation2 + $0x1c8] sm:$0xff]  ;;  %2743 = vst.msk [vmem:[#allocation2 + $0x1f8] sm:$0xff] %vm231_vm2, %v2678_v26  ;;  %2741 = vst.msk [vmem:[#allocation2 + $0x1e8] sm:$0xff] %vm231_vm2, %v2676_v43 }
 0x251   : > { %3127 = vst.msk [vmem:[%s4825_s24 + $0xec] sm:$0xf] %vm3067_vm3, %v3598_v47  ;;  %v3596_v19 = vpack.c.bf16 %v2804_v28, %v2804_v28 }
 0x253   : > { %3125 = vst.msk [vmem:[%s4825_s24 + $0xe4] sm:$0xf] %vm3067_vm3, %v3596_v19  ;;  %v2809_v39 = vld [vmem:[#allocation2 + $0x1f0] sm:$0xff]  ;;  %v2807_v1 = vld [vmem:[#allocation2 + $0x1e0] sm:$0xff] }
 0x254   : > { %v3601_v7 = vpack.c.bf16 %v2809_v39, %v2809_v39  ;;  %v3599_v13 = vpack.c.bf16 %v2807_v1, %v2807_v1 }
 0x256   : > { %3130 = vst.msk [vmem:[%s4825_s24 + $0xf8] sm:$0xf] %vm3067_vm3, %v3601_v7  ;;  %3128 = vst.msk [vmem:[%s4825_s24 + $0xf0] sm:$0xf] %vm3067_vm3, %v3599_v13 }
 0x257   : > { %v2810_v58 = vld [vmem:[#allocation2 + $0x1f8] sm:$0xff]  ;;  %v2808_v33 = vld [vmem:[#allocation2 + $0x1e8] sm:$0xff] }
 0x258   : > { %v3602_v27 = vpack.c.bf16 %v2810_v58, %v2810_v58  ;;  %v3600_v42 = vpack.c.bf16 %v2808_v33, %v2808_v33 }
 0x25a   : > { %3131 = vst.msk [vmem:[%s4825_s24 + $0xfc] sm:$0xf] %vm3067_vm3, %v3602_v27  ;;  %3129 = vst.msk [vmem:[%s4825_s24 + $0xf4] sm:$0xf] %vm3067_vm3, %v3600_v42 }
 0x25b PF: > { %s12_s11 = sadd.s32 1, %s4057_s11   ;;  %s5191_s9 = smov %s4053_s10 }
 0x25c   : > { %p9_p5 = scmp.ge.s32.totalorder %s12_s11, 34   ;;  %s5192_s10 = smov %s5194_s12 }
 0x25e   :  { %11 = sbr.rel (!%p9_p5) target bundleno = 2 (0x2), region = 69 }

</bundles_post_ra>
